<compile_context>
chip_gen: v5e
topology: v5e:2x2
jax: 0.10.0
libtpu: 0.0.40
codegen_flags: <defaults>
</compile_context>

<pallas_src>
import jax
import jax.numpy as jnp
import numpy as np
from jax import lax
from jax.experimental import pallas as pl
from jax.experimental.pallas import tpu as pltpu


def _round_up(v, m):
    return -(-v // m) * m


# ----------------------------------------------------------------------------
# Fused kernel: one batch element per grid step.
#   conv(3x3, pad=1) as 9 per-tap MXU matmuls (K=Cin, f32 accumulate)
#   -> folded BN affine + ReLU (f32 VPU)
#   -> global average pool (XLU sublane reduction)
#   -> fc1 + ReLU + fc2 (single matmuls, lane-padded)
# ----------------------------------------------------------------------------
def _fused_vision_head_kernel(x_ref, wconv_ref, scale_ref, shift_ref,
                              w1_ref, b1_ref, w2_ref, b2_ref, o_ref):
    seq, hp, wp, cin = x_ref.shape
    h, w = hp - 2, wp - 2
    hw = h * w
    hidden_pad = wconv_ref.shape[-1]
    mm_dtype = wconv_ref.dtype

    # --- conv 3x3 / pad=1: accumulate 9 shifted-window taps on the MXU (f32 acc)
    acc = None
    for kh in range(3):
        for kw in range(3):
            tap = x_ref[:, kh:kh + h, kw:kw + w, :].reshape(seq * hw, cin)
            part = jnp.dot(tap, wconv_ref[kh * 3 + kw],
                           preferred_element_type=jnp.float32)
            acc = part if acc is None else acc + part

    # --- folded BatchNorm affine (conv bias folded into shift) + ReLU (f32 VPU)
    y = jnp.maximum(acc * scale_ref[...] + shift_ref[...], 0.0)

    # --- global average pool: sublane reduction over H*W (XLU); the leading-dim
    #     split (seq*hw -> seq, hw) is free because hw % 8 == 0.
    pooled = jnp.mean(y.reshape(seq, hw, hidden_pad), axis=1)      # (seq, hidden_pad)

    # --- flatten seq-major (matches torch flatten of (seq, hidden)) as a lane
    #     concat, then fc1 as ONE K = seq*hidden_pad matmul
    flat = jnp.concatenate([pooled[s:s + 1, :] for s in range(seq)], axis=1)
    hdd = jnp.dot(flat.astype(mm_dtype), w1_ref[...],
                  preferred_element_type=jnp.float32) + b1_ref[...]
    hdd = jnp.maximum(hdd, 0.0)                  # dropout(0.5) = identity at inference
    out = jnp.dot(hdd.astype(mm_dtype), w2_ref[...],
                  preferred_element_type=jnp.float32) + b2_ref[...]

    o_ref[0] = out.astype(o_ref.dtype)           # lane-dense (1, out_pad) store


# ----------------------------------------------------------------------------
# Wrapper: NCHW->NHWC + halo pad, parameter folding/padding, one pallas_call
# ----------------------------------------------------------------------------
def vision_head_forward(x_bscHW, params, *, mm_dtype=jnp.bfloat16):
    """x_bscHW: backbone features, (batch, seq, C_in, H, W).

    mm_dtype: dtype fed to the MXU (bf16 default on all TPU generations;
    accumulation and the BN/ReLU epilogue stay f32)."""
    batch, seq, cin, h, w = x_bscHW.shape
    hw = h * w
    hp, wp = h + 2, w + 2
    hidden = params["conv_w"].shape[-1]
    dim_ff = params["w1_t"].shape[-1]
    classes = params["w2_t"].shape[-1]
    hidden_pad = _round_up(hidden, 128)
    dim_ff_pad = _round_up(dim_ff, 128)
    out_pad = _round_up(classes, 128)
    assert w % 8 == 0, "spatial width must be sublane-aligned (see TODO)"

    # ---- single wrapper-side relayout: NCHW -> NHWC, zero halo pad, cast ----
    xn = jnp.transpose(x_bscHW, (0, 1, 3, 4, 2)).reshape(batch * seq, h, w, cin)
    x_pad = jnp.pad(xn.astype(mm_dtype), ((0, 0), (1, 1), (1, 1), (0, 0)))

    # ---- fold conv bias + BatchNorm into one affine; pad hidden to 128 lanes ---
    eps = 1e-5
    inv_std = 1.0 / jnp.sqrt(params["bn_var"] + eps)
    scale = params["bn_gamma"] * inv_std
    shift = (params["conv_b"] - params["bn_mean"]) * scale + params["bn_beta"]
    scale_p = jnp.pad(scale, (0, hidden_pad - hidden))[None, :].astype(jnp.float32)
    shift_p = jnp.pad(shift, (0, hidden_pad - hidden))[None, :].astype(jnp.float32)

    # conv weight HWIO (3,3,Cin,hidden) -> 9 taps of (Cin, hidden_pad)
    w_conv = jnp.pad(params["conv_w"].reshape(9, cin, hidden),
                     ((0, 0), (0, 0), (0, hidden_pad - hidden))).astype(mm_dtype)

    # fc1: (seq*hidden, dim_ff) -> (seq*hidden_pad, dim_ff_pad), zero rows/cols
    w1 = params["w1_t"].reshape(seq, hidden, dim_ff)
    w1 = jnp.pad(w1, ((0, 0), (0, hidden_pad - hidden), (0, dim_ff_pad - dim_ff)))
    w1_p = w1.reshape(seq * hidden_pad, dim_ff_pad).astype(mm_dtype)
    b1_p = jnp.pad(params["b1"], (0, dim_ff_pad - dim_ff))[None, :].astype(jnp.float32)

    w2_p = jnp.pad(params["w2_t"],
                   ((0, dim_ff_pad - dim_ff), (0, out_pad - classes))).astype(mm_dtype)
    b2_p = jnp.pad(params["b2"], (0, out_pad - classes))[None, :].astype(jnp.float32)

    # ---- explicit VMEM budget (v7x: 64 MiB physical / 32 MiB scoped default) ---
    itemsize = jnp.dtype(mm_dtype).itemsize
    x_blk = seq * hp * wp * cin * itemsize                       # double-buffered
    consts = ((w_conv.size + w1_p.size + w2_p.size) * itemsize
              + (scale_p.size + shift_p.size + b1_p.size + b2_p.size) * 4)
    temps = 4 * seq * hw * hidden_pad * 4                        # acc / y / relayouts
    vmem_limit = int(min(max(2 * x_blk + consts + temps + (4 << 20), 16 << 20),
                         48 << 20))

    def _const_spec(shape):
        # constant index map -> single-buffer (double-buffering weights wastes VMEM)
        return pl.BlockSpec(shape, lambda i: (0,) * len(shape),
                            pipeline_mode=pl.Buffered(1))

    out = pl.pallas_call(
        _fused_vision_head_kernel,
        out_shape=jax.ShapeDtypeStruct((batch, 1, out_pad), jnp.float32),
        grid=(batch,),
        in_specs=[
            pl.BlockSpec((seq, hp, wp, cin), lambda i: (i, 0, 0, 0)),  # feature tile
            _const_spec((9, cin, hidden_pad)),                         # conv taps
            _const_spec((1, hidden_pad)),                              # BN scale
            _const_spec((1, hidden_pad)),                              # BN shift (+bias)
            _const_spec((seq * hidden_pad, dim_ff_pad)),               # fc1 weight
            _const_spec((1, dim_ff_pad)),                              # fc1 bias
            _const_spec((dim_ff_pad, out_pad)),                        # fc2 weight
            _const_spec((1, out_pad)),                                 # fc2 bias
        ],
        out_specs=pl.BlockSpec((1, 1, out_pad), lambda i: (i, 0, 0)),
        compiler_params=pltpu.CompilerParams(
            dimension_semantics=("parallel",),   # per-step independent -> megacore-safe
            vmem_limit_bytes=vmem_limit),
    )(x_pad, w_conv, scale_p, shift_p, w1_p, b1_p, w2_p, b2_p)

    return out[:, 0, :classes]


# ----------------------------------------------------------------------------
# Pure-JAX reference for correctness check
# ----------------------------------------------------------------------------
def reference_forward(x_bscHW, params):
    batch, seq, cin, h, w = x_bscHW.shape
    x = x_bscHW.reshape(batch * seq, cin, h, w)
    y = lax.conv_general_dilated(
        x, jnp.transpose(params["conv_w"], (3, 2, 0, 1)),  # HWIO -> OIHW
        window_strides=(1, 1), padding="SAME",
        dimension_numbers=("NCHW", "OIHW", "NCHW"))
    y = y + params["conv_b"][None, :, None, None]
    eps = 1e-5
    y = (y - params["bn_mean"][None, :, None, None]) / jnp.sqrt(
        params["bn_var"][None, :, None, None] + eps)
    y = y * params["bn_gamma"][None, :, None, None] + params["bn_beta"][None, :, None, None]
    y = jnp.maximum(y, 0.0)
    pooled = jnp.mean(y, axis=(2, 3))                       # (N, hidden)
    flat = pooled.reshape(batch, -1)
    hdd = jnp.maximum(flat @ params["w1_t"] + params["b1"], 0.0)
    return hdd @ params["w2_t"] + params["b2"]


if __name__ == "__main__":
    # Small shapes consistent with the module's head (synthetic, not a checkpoint)
    batch, seq_len = 2, 4
    input_dim, hidden_dim = 16, 32
    H = W = 8
    dim_ff, classes = 64, 5

    key = jax.random.PRNGKey(0)
    ks = jax.random.split(key, 10)

    params = {
        "conv_w": 0.1 * jax.random.normal(ks[0], (3, 3, input_dim, hidden_dim), jnp.float32),
        "conv_b": 0.1 * jax.random.normal(ks[1], (hidden_dim,), jnp.float32),
        "bn_gamma": 1.0 + 0.1 * jax.random.normal(ks[2], (hidden_dim,), jnp.float32),
        "bn_beta": 0.1 * jax.random.normal(ks[3], (hidden_dim,), jnp.float32),
        "bn_mean": 0.1 * jax.random.normal(ks[4], (hidden_dim,), jnp.float32),
        "bn_var": jnp.abs(jax.random.normal(ks[5], (hidden_dim,), jnp.float32)) + 0.5,
        "w1_t": 0.05 * jax.random.normal(ks[6], (seq_len * hidden_dim, dim_ff), jnp.float32),
        "b1": 0.05 * jax.random.normal(ks[7], (dim_ff,), jnp.float32),
        "w2_t": 0.05 * jax.random.normal(ks[8], (dim_ff, classes), jnp.float32),
        "b2": 0.05 * jax.random.normal(ks[9], (classes,), jnp.float32),
    }

    # backbone feature maps: (batch, seq, C_in, H, W)
    x = jax.random.normal(jax.random.PRNGKey(42),
                          (batch, seq_len, input_dim, H, W), jnp.float32)

    fwd = jax.jit(vision_head_forward, static_argnames=("mm_dtype",))

    ref = jax.block_until_ready(reference_forward(x, params))

    # exact-precision path, tight check
    out_f32 = jax.block_until_ready(fwd(x, params, mm_dtype=jnp.float32))
    assert out_f32.shape == (batch, classes)
    np.testing.assert_allclose(np.asarray(out_f32), np.asarray(ref), rtol=1e-4, atol=1e-4)

    # bf16 MXU operands (default fast path on v5e/v6e/v7x), f32 accumulation; loose check
    out_bf16 = jax.block_until_ready(fwd(x, params, mm_dtype=jnp.bfloat16))
    assert out_bf16.shape == (batch, classes)
    np.testing.assert_allclose(np.asarray(out_bf16), np.asarray(ref), rtol=5e-2, atol=5e-2)

    print("KERNEL_OK")
</pallas_src>

<mosaic_0001>
module attributes {stable_mosaic.version = 11 : i64} {
  func.func @_fused_vision_head_kernel(%arg0: i32, %arg1: memref<4x10x10x16xf32, #tpu.memory_space<vmem>>, %arg2: memref<9x16x128xf32, #tpu.memory_space<vmem>>, %arg3: memref<1x128xf32, #tpu.memory_space<vmem>>, %arg4: memref<1x128xf32, #tpu.memory_space<vmem>>, %arg5: memref<512x128xf32, #tpu.memory_space<vmem>>, %arg6: memref<1x128xf32, #tpu.memory_space<vmem>>, %arg7: memref<128x128xf32, #tpu.memory_space<vmem>>, %arg8: memref<1x128xf32, #tpu.memory_space<vmem>>, %arg9: memref<1x1x128xf32, #tpu.memory_space<vmem>>) attributes {dimension_semantics = [#tpu.dimension_semantics<parallel>], iteration_bounds = array<i64: 2>, scalar_prefetch = 0 : i64, scratch_operands = 0 : i64, tpu.core_type = #tpu.core_type<tc>, window_params = [{transform_indices = @transform_0, window_bounds = array<i64: 4, 10, 10, 16>}, {pipeline_mode = #tpu.pipeline_mode<synchronous>, transform_indices = @transform_1, window_bounds = array<i64: 9, 16, 128>}, {pipeline_mode = #tpu.pipeline_mode<synchronous>, transform_indices = @transform_2, window_bounds = array<i64: 1, 128>}, {pipeline_mode = #tpu.pipeline_mode<synchronous>, transform_indices = @transform_3, window_bounds = array<i64: 1, 128>}, {pipeline_mode = #tpu.pipeline_mode<synchronous>, transform_indices = @transform_4, window_bounds = array<i64: 512, 128>}, {pipeline_mode = #tpu.pipeline_mode<synchronous>, transform_indices = @transform_5, window_bounds = array<i64: 1, 128>}, {pipeline_mode = #tpu.pipeline_mode<synchronous>, transform_indices = @transform_6, window_bounds = array<i64: 128, 128>}, {pipeline_mode = #tpu.pipeline_mode<synchronous>, transform_indices = @transform_7, window_bounds = array<i64: 1, 128>}, {transform_indices = @transform_8, window_bounds = array<i64: 1, 1, 128>}]} {
    %c0 = arith.constant 0 : index
    %c0_0 = arith.constant 0 : index
    %c0_1 = arith.constant 0 : index
    %c0_2 = arith.constant 0 : index
    %0 = vector.load %arg1[%c0, %c0_0, %c0_1, %c0_2] : memref<4x10x10x16xf32, #tpu.memory_space<vmem>>, vector<4x8x8x16xf32>
    %1 = vector.shape_cast %0 : vector<4x8x8x16xf32> to vector<256x16xf32>
    %c0_3 = arith.constant 0 : index
    %c0_4 = arith.constant 0 : index
    %c0_5 = arith.constant 0 : index
    %2 = vector.load %arg2[%c0_3, %c0_4, %c0_5] : memref<9x16x128xf32, #tpu.memory_space<vmem>>, vector<1x16x128xf32>
    %3 = vector.shape_cast %2 : vector<1x16x128xf32> to vector<16x128xf32>
    %cst = arith.constant dense<0.000000e+00> : vector<256x128xf32>
    %4 = tpu.matmul %1, %3, %cst {dimension_numbers = #tpu.dot_dimension_numbers<[1], [0], [0], [1], [0, 0, 1, 1], [], []>} : vector<256x16xf32>, vector<16x128xf32>, vector<256x128xf32> -> vector<256x128xf32>
    %c0_6 = arith.constant 0 : index
    %c0_7 = arith.constant 0 : index
    %c1 = arith.constant 1 : index
    %c0_8 = arith.constant 0 : index
    %5 = vector.load %arg1[%c0_6, %c0_7, %c1, %c0_8] : memref<4x10x10x16xf32, #tpu.memory_space<vmem>>, vector<4x8x8x16xf32>
    %6 = vector.shape_cast %5 : vector<4x8x8x16xf32> to vector<256x16xf32>
    %c1_9 = arith.constant 1 : index
    %c0_10 = arith.constant 0 : index
    %c0_11 = arith.constant 0 : index
    %7 = vector.load %arg2[%c1_9, %c0_10, %c0_11] : memref<9x16x128xf32, #tpu.memory_space<vmem>>, vector<1x16x128xf32>
    %8 = vector.shape_cast %7 : vector<1x16x128xf32> to vector<16x128xf32>
    %cst_12 = arith.constant dense<0.000000e+00> : vector<256x128xf32>
    %9 = tpu.matmul %6, %8, %cst_12 {dimension_numbers = #tpu.dot_dimension_numbers<[1], [0], [0], [1], [0, 0, 1, 1], [], []>} : vector<256x16xf32>, vector<16x128xf32>, vector<256x128xf32> -> vector<256x128xf32>
    %10 = arith.addf %4, %9 : vector<256x128xf32>
    %c0_13 = arith.constant 0 : index
    %c0_14 = arith.constant 0 : index
    %c2 = arith.constant 2 : index
    %c0_15 = arith.constant 0 : index
    %11 = vector.load %arg1[%c0_13, %c0_14, %c2, %c0_15] : memref<4x10x10x16xf32, #tpu.memory_space<vmem>>, vector<4x8x8x16xf32>
    %12 = vector.shape_cast %11 : vector<4x8x8x16xf32> to vector<256x16xf32>
    %c2_16 = arith.constant 2 : index
    %c0_17 = arith.constant 0 : index
    %c0_18 = arith.constant 0 : index
    %13 = vector.load %arg2[%c2_16, %c0_17, %c0_18] : memref<9x16x128xf32, #tpu.memory_space<vmem>>, vector<1x16x128xf32>
    %14 = vector.shape_cast %13 : vector<1x16x128xf32> to vector<16x128xf32>
    %cst_19 = arith.constant dense<0.000000e+00> : vector<256x128xf32>
    %15 = tpu.matmul %12, %14, %cst_19 {dimension_numbers = #tpu.dot_dimension_numbers<[1], [0], [0], [1], [0, 0, 1, 1], [], []>} : vector<256x16xf32>, vector<16x128xf32>, vector<256x128xf32> -> vector<256x128xf32>
    %16 = arith.addf %10, %15 : vector<256x128xf32>
    %c0_20 = arith.constant 0 : index
    %c1_21 = arith.constant 1 : index
    %c0_22 = arith.constant 0 : index
    %c0_23 = arith.constant 0 : index
    %17 = vector.load %arg1[%c0_20, %c1_21, %c0_22, %c0_23] : memref<4x10x10x16xf32, #tpu.memory_space<vmem>>, vector<4x8x8x16xf32>
    %18 = vector.shape_cast %17 : vector<4x8x8x16xf32> to vector<256x16xf32>
    %c3 = arith.constant 3 : index
    %c0_24 = arith.constant 0 : index
    %c0_25 = arith.constant 0 : index
    %19 = vector.load %arg2[%c3, %c0_24, %c0_25] : memref<9x16x128xf32, #tpu.memory_space<vmem>>, vector<1x16x128xf32>
    %20 = vector.shape_cast %19 : vector<1x16x128xf32> to vector<16x128xf32>
    %cst_26 = arith.constant dense<0.000000e+00> : vector<256x128xf32>
    %21 = tpu.matmul %18, %20, %cst_26 {dimension_numbers = #tpu.dot_dimension_numbers<[1], [0], [0], [1], [0, 0, 1, 1], [], []>} : vector<256x16xf32>, vector<16x128xf32>, vector<256x128xf32> -> vector<256x128xf32>
    %22 = arith.addf %16, %21 : vector<256x128xf32>
    %c0_27 = arith.constant 0 : index
    %c1_28 = arith.constant 1 : index
    %c1_29 = arith.constant 1 : index
    %c0_30 = arith.constant 0 : index
    %23 = vector.load %arg1[%c0_27, %c1_28, %c1_29, %c0_30] : memref<4x10x10x16xf32, #tpu.memory_space<vmem>>, vector<4x8x8x16xf32>
    %24 = vector.shape_cast %23 : vector<4x8x8x16xf32> to vector<256x16xf32>
    %c4 = arith.constant 4 : index
    %c0_31 = arith.constant 0 : index
    %c0_32 = arith.constant 0 : index
    %25 = vector.load %arg2[%c4, %c0_31, %c0_32] : memref<9x16x128xf32, #tpu.memory_space<vmem>>, vector<1x16x128xf32>
    %26 = vector.shape_cast %25 : vector<1x16x128xf32> to vector<16x128xf32>
    %cst_33 = arith.constant dense<0.000000e+00> : vector<256x128xf32>
    %27 = tpu.matmul %24, %26, %cst_33 {dimension_numbers = #tpu.dot_dimension_numbers<[1], [0], [0], [1], [0, 0, 1, 1], [], []>} : vector<256x16xf32>, vector<16x128xf32>, vector<256x128xf32> -> vector<256x128xf32>
    %28 = arith.addf %22, %27 : vector<256x128xf32>
    %c0_34 = arith.constant 0 : index
    %c1_35 = arith.constant 1 : index
    %c2_36 = arith.constant 2 : index
    %c0_37 = arith.constant 0 : index
    %29 = vector.load %arg1[%c0_34, %c1_35, %c2_36, %c0_37] : memref<4x10x10x16xf32, #tpu.memory_space<vmem>>, vector<4x8x8x16xf32>
    %30 = vector.shape_cast %29 : vector<4x8x8x16xf32> to vector<256x16xf32>
    %c5 = arith.constant 5 : index
    %c0_38 = arith.constant 0 : index
    %c0_39 = arith.constant 0 : index
    %31 = vector.load %arg2[%c5, %c0_38, %c0_39] : memref<9x16x128xf32, #tpu.memory_space<vmem>>, vector<1x16x128xf32>
    %32 = vector.shape_cast %31 : vector<1x16x128xf32> to vector<16x128xf32>
    %cst_40 = arith.constant dense<0.000000e+00> : vector<256x128xf32>
    %33 = tpu.matmul %30, %32, %cst_40 {dimension_numbers = #tpu.dot_dimension_numbers<[1], [0], [0], [1], [0, 0, 1, 1], [], []>} : vector<256x16xf32>, vector<16x128xf32>, vector<256x128xf32> -> vector<256x128xf32>
    %34 = arith.addf %28, %33 : vector<256x128xf32>
    %c0_41 = arith.constant 0 : index
    %c2_42 = arith.constant 2 : index
    %c0_43 = arith.constant 0 : index
    %c0_44 = arith.constant 0 : index
    %35 = vector.load %arg1[%c0_41, %c2_42, %c0_43, %c0_44] : memref<4x10x10x16xf32, #tpu.memory_space<vmem>>, vector<4x8x8x16xf32>
    %36 = vector.shape_cast %35 : vector<4x8x8x16xf32> to vector<256x16xf32>
    %c6 = arith.constant 6 : index
    %c0_45 = arith.constant 0 : index
    %c0_46 = arith.constant 0 : index
    %37 = vector.load %arg2[%c6, %c0_45, %c0_46] : memref<9x16x128xf32, #tpu.memory_space<vmem>>, vector<1x16x128xf32>
    %38 = vector.shape_cast %37 : vector<1x16x128xf32> to vector<16x128xf32>
    %cst_47 = arith.constant dense<0.000000e+00> : vector<256x128xf32>
    %39 = tpu.matmul %36, %38, %cst_47 {dimension_numbers = #tpu.dot_dimension_numbers<[1], [0], [0], [1], [0, 0, 1, 1], [], []>} : vector<256x16xf32>, vector<16x128xf32>, vector<256x128xf32> -> vector<256x128xf32>
    %40 = arith.addf %34, %39 : vector<256x128xf32>
    %c0_48 = arith.constant 0 : index
    %c2_49 = arith.constant 2 : index
    %c1_50 = arith.constant 1 : index
    %c0_51 = arith.constant 0 : index
    %41 = vector.load %arg1[%c0_48, %c2_49, %c1_50, %c0_51] : memref<4x10x10x16xf32, #tpu.memory_space<vmem>>, vector<4x8x8x16xf32>
    %42 = vector.shape_cast %41 : vector<4x8x8x16xf32> to vector<256x16xf32>
    %c7 = arith.constant 7 : index
    %c0_52 = arith.constant 0 : index
    %c0_53 = arith.constant 0 : index
    %43 = vector.load %arg2[%c7, %c0_52, %c0_53] : memref<9x16x128xf32, #tpu.memory_space<vmem>>, vector<1x16x128xf32>
    %44 = vector.shape_cast %43 : vector<1x16x128xf32> to vector<16x128xf32>
    %cst_54 = arith.constant dense<0.000000e+00> : vector<256x128xf32>
    %45 = tpu.matmul %42, %44, %cst_54 {dimension_numbers = #tpu.dot_dimension_numbers<[1], [0], [0], [1], [0, 0, 1, 1], [], []>} : vector<256x16xf32>, vector<16x128xf32>, vector<256x128xf32> -> vector<256x128xf32>
    %46 = arith.addf %40, %45 : vector<256x128xf32>
    %c0_55 = arith.constant 0 : index
    %c2_56 = arith.constant 2 : index
    %c2_57 = arith.constant 2 : index
    %c0_58 = arith.constant 0 : index
    %47 = vector.load %arg1[%c0_55, %c2_56, %c2_57, %c0_58] : memref<4x10x10x16xf32, #tpu.memory_space<vmem>>, vector<4x8x8x16xf32>
    %48 = vector.shape_cast %47 : vector<4x8x8x16xf32> to vector<256x16xf32>
    %c8 = arith.constant 8 : index
    %c0_59 = arith.constant 0 : index
    %c0_60 = arith.constant 0 : index
    %49 = vector.load %arg2[%c8, %c0_59, %c0_60] : memref<9x16x128xf32, #tpu.memory_space<vmem>>, vector<1x16x128xf32>
    %50 = vector.shape_cast %49 : vector<1x16x128xf32> to vector<16x128xf32>
    %cst_61 = arith.constant dense<0.000000e+00> : vector<256x128xf32>
    %51 = tpu.matmul %48, %50, %cst_61 {dimension_numbers = #tpu.dot_dimension_numbers<[1], [0], [0], [1], [0, 0, 1, 1], [], []>} : vector<256x16xf32>, vector<16x128xf32>, vector<256x128xf32> -> vector<256x128xf32>
    %52 = arith.addf %46, %51 : vector<256x128xf32>
    %c0_62 = arith.constant 0 : index
    %c0_63 = arith.constant 0 : index
    %53 = vector.load %arg3[%c0_62, %c0_63] : memref<1x128xf32, #tpu.memory_space<vmem>>, vector<1x128xf32>
    %54 = vector.broadcast %53 : vector<1x128xf32> to vector<256x128xf32>
    %55 = arith.mulf %52, %54 : vector<256x128xf32>
    %c0_64 = arith.constant 0 : index
    %c0_65 = arith.constant 0 : index
    %56 = vector.load %arg4[%c0_64, %c0_65] : memref<1x128xf32, #tpu.memory_space<vmem>>, vector<1x128xf32>
    %57 = vector.broadcast %56 : vector<1x128xf32> to vector<256x128xf32>
    %58 = arith.addf %55, %57 : vector<256x128xf32>
    %cst_66 = arith.constant 0.000000e+00 : f32
    %59 = vector.broadcast %cst_66 : f32 to vector<256x128xf32>
    %60 = arith.maximumf %58, %59 : vector<256x128xf32>
    %61 = vector.shape_cast %60 : vector<256x128xf32> to vector<4x64x128xf32>
    %cst_67 = arith.constant dense<0.000000e+00> : vector<4x128xf32>
    %62 = vector.multi_reduction <add>, %61, %cst_67 [1] : vector<4x64x128xf32> to vector<4x128xf32>
    %cst_68 = arith.constant 6.400000e+01 : f32
    %63 = vector.broadcast %cst_68 : f32 to vector<4x128xf32>
    %64 = arith.divf %62, %63 : vector<4x128xf32>
    %65 = vector.extract_strided_slice %64 {offsets = [0, 0], sizes = [1, 128], strides = [1, 1]} : vector<4x128xf32> to vector<1x128xf32>
    %66 = vector.extract_strided_slice %64 {offsets = [1, 0], sizes = [1, 128], strides = [1, 1]} : vector<4x128xf32> to vector<1x128xf32>
    %67 = vector.extract_strided_slice %64 {offsets = [2, 0], sizes = [1, 128], strides = [1, 1]} : vector<4x128xf32> to vector<1x128xf32>
    %68 = vector.extract_strided_slice %64 {offsets = [3, 0], sizes = [1, 128], strides = [1, 1]} : vector<4x128xf32> to vector<1x128xf32>
    %69 = tpu.concatenate %65, %66, %67, %68 in 1 : vector<1x128xf32>, vector<1x128xf32>, vector<1x128xf32>, vector<1x128xf32> -> vector<1x512xf32>
    %c0_69 = arith.constant 0 : index
    %c0_70 = arith.constant 0 : index
    %70 = vector.load %arg5[%c0_69, %c0_70] : memref<512x128xf32, #tpu.memory_space<vmem>>, vector<512x128xf32>
    %cst_71 = arith.constant dense<0.000000e+00> : vector<1x128xf32>
    %71 = tpu.matmul %69, %70, %cst_71 {dimension_numbers = #tpu.dot_dimension_numbers<[1], [0], [0], [1], [0, 0, 1, 1], [], []>} : vector<1x512xf32>, vector<512x128xf32>, vector<1x128xf32> -> vector<1x128xf32>
    %c0_72 = arith.constant 0 : index
    %c0_73 = arith.constant 0 : index
    %72 = vector.load %arg6[%c0_72, %c0_73] : memref<1x128xf32, #tpu.memory_space<vmem>>, vector<1x128xf32>
    %73 = arith.addf %71, %72 : vector<1x128xf32>
    %cst_74 = arith.constant 0.000000e+00 : f32
    %74 = vector.broadcast %cst_74 : f32 to vector<1x128xf32>
    %75 = arith.maximumf %73, %74 : vector<1x128xf32>
    %c0_75 = arith.constant 0 : index
    %c0_76 = arith.constant 0 : index
    %76 = vector.load %arg7[%c0_75, %c0_76] : memref<128x128xf32, #tpu.memory_space<vmem>>, vector<128x128xf32>
    %cst_77 = arith.constant dense<0.000000e+00> : vector<1x128xf32>
    %77 = tpu.matmul %75, %76, %cst_77 {dimension_numbers = #tpu.dot_dimension_numbers<[1], [0], [0], [1], [0, 0, 1, 1], [], []>} : vector<1x128xf32>, vector<128x128xf32>, vector<1x128xf32> -> vector<1x128xf32>
    %c0_78 = arith.constant 0 : index
    %c0_79 = arith.constant 0 : index
    %78 = vector.load %arg8[%c0_78, %c0_79] : memref<1x128xf32, #tpu.memory_space<vmem>>, vector<1x128xf32>
    %79 = arith.addf %77, %78 : vector<1x128xf32>
    %c0_80 = arith.constant 0 : index
    %c0_81 = arith.constant 0 : index
    %c0_82 = arith.constant 0 : index
    %80 = vector.load %arg9[%c0_80, %c0_81, %c0_82] : memref<1x1x128xf32, #tpu.memory_space<vmem>>, vector<1x1x128xf32>
    %81 = vector.shape_cast %80 : vector<1x1x128xf32> to vector<1x128xf32>
    %82 = vector.shape_cast %79 : vector<1x128xf32> to vector<1x1x128xf32>
    tpu.vector_store %arg9[%c0_80, %c0_81, %c0_82], %82 {strides = array<i32>} : memref<1x1x128xf32, #tpu.memory_space<vmem>>, vector<1x1x128xf32>,
    return
  }
  func.func @transform_0(%arg0: i32) -> (i32, i32, i32, i32) {
    %c0_i32 = arith.constant 0 : i32
    %c0_i32_0 = arith.constant 0 : i32
    %c0_i32_1 = arith.constant 0 : i32
    %c0_i32_2 = arith.constant 0 : i32
    return %arg0, %c0_i32, %c0_i32_0, %c0_i32_1 : i32, i32, i32, i32
  }
  func.func @transform_1(%arg0: i32) -> (i32, i32, i32) {
    %c0_i32 = arith.constant 0 : i32
    %c0_i32_0 = arith.constant 0 : i32
    %c0_i32_1 = arith.constant 0 : i32
    %c0_i32_2 = arith.constant 0 : i32
    return %c0_i32, %c0_i32_0, %c0_i32_1 : i32, i32, i32
  }
  func.func @transform_2(%arg0: i32) -> (i32, i32) {
    %c0_i32 = arith.constant 0 : i32
    %c0_i32_0 = arith.constant 0 : i32
    %c0_i32_1 = arith.constant 0 : i32
    return %c0_i32, %c0_i32_0 : i32, i32
  }
  func.func @transform_3(%arg0: i32) -> (i32, i32) {
    %c0_i32 = arith.constant 0 : i32
    %c0_i32_0 = arith.constant 0 : i32
    %c0_i32_1 = arith.constant 0 : i32
    return %c0_i32, %c0_i32_0 : i32, i32
  }
  func.func @transform_4(%arg0: i32) -> (i32, i32) {
    %c0_i32 = arith.constant 0 : i32
    %c0_i32_0 = arith.constant 0 : i32
    %c0_i32_1 = arith.constant 0 : i32
    return %c0_i32, %c0_i32_0 : i32, i32
  }
  func.func @transform_5(%arg0: i32) -> (i32, i32) {
    %c0_i32 = arith.constant 0 : i32
    %c0_i32_0 = arith.constant 0 : i32
    %c0_i32_1 = arith.constant 0 : i32
    return %c0_i32, %c0_i32_0 : i32, i32
  }
  func.func @transform_6(%arg0: i32) -> (i32, i32) {
    %c0_i32 = arith.constant 0 : i32
    %c0_i32_0 = arith.constant 0 : i32
    %c0_i32_1 = arith.constant 0 : i32
    return %c0_i32, %c0_i32_0 : i32, i32
  }
  func.func @transform_7(%arg0: i32) -> (i32, i32) {
    %c0_i32 = arith.constant 0 : i32
    %c0_i32_0 = arith.constant 0 : i32
    %c0_i32_1 = arith.constant 0 : i32
    return %c0_i32, %c0_i32_0 : i32, i32
  }
  func.func @transform_8(%arg0: i32) -> (i32, i32, i32) {
    %c0_i32 = arith.constant 0 : i32
    %c0_i32_0 = arith.constant 0 : i32
    %c0_i32_1 = arith.constant 0 : i32
    return %arg0, %c0_i32, %c0_i32_0 : i32, i32, i32
  }
}

</mosaic_0001>

<bundles_post_ra>
// kernel: vision_head_forward.1
= control target key start
LH: loop header
LB: loop body
LE: loop exit
PB: predicated region body
PF: predicated region fallthrough
CT: control target
= control target key end

     0   :  { %13 = vsyncpa [#allocation3], 0  ;;  %s5532_s0 = inlined_call_operand.vmem [shape: f32[8,10,10,16], index: 0, kind: input, shape index: {}]   ;;  %s5533_s1 = inlined_call_operand.vmem [shape: f32[9,16,128], index: 1, kind: input, shape index: {}]   ;;  %s5534_s2 = inlined_call_operand.vmem [shape: f32[1,128], index: 2, kind: input, shape index: {}]   ;;  %s5535_s3 = inlined_call_operand.vmem [shape: f32[1,128], index: 3, kind: input, shape index: {}]   ;;  %s5536_s4 = inlined_call_operand.vmem [shape: f32[512,128], index: 4, kind: input, shape index: {}]   ;;  %s5537_s5 = inlined_call_operand.vmem [shape: f32[1,128], index: 5, kind: input, shape index: {}]   ;;  %s5538_s6 = inlined_call_operand.vmem [shape: f32[128,128], index: 6, kind: input, shape index: {}]   ;;  %s5539_s7 = inlined_call_operand.vmem [shape: f32[1,128], index: 7, kind: input, shape index: {}]   ;;  %s5540_s8 = inlined_call_operand.hbm [shape: f32[2,1,128], index: 8, kind: output, shape index: {}]  }
   0x1   :  { %15 = vsyncpa [#allocation3 + $0x1], 0  ;;  %s3816_s27 = smov 0   ;;  %s3818_s28 = smov 0  }
   0x2   :  { %s3820_s29 = smov 0   ;;  %s3822_s30 = smov 0  }
   0x3 LB: > { %s3837_s9 = sadd.s32 4294967295, %s3768_s30   ;;  %s3149_s10 = sadd.s32 4294967294, %s3768_s30   ;;  %s3768_s30 = sphi %s3822_s30, %s5694_s30   ;;  %s3764_s29 = sphi %s3820_s29, %s5693_s29   ;;  %s3760_s28 = sphi %s3818_s28, %s5692_s28   ;;  %s3756_s27 = sphi %s3816_s27, %s5691_s27  }
   0x4   : > { %s3841_s11 = sadd.s32 1, %s3768_s30   ;;  %s201_s12 = sadd.s32 1, %s3764_s29 }
   0x5   : > { %s198_s13 = ssub.s32 %s3768_s30, %s3841_s11  ;;  %p211_p0 = scmp.ne.s32.totalorder %s3764_s29, %s3760_s28 }
   0x6   : > { %p199_p1 = scmp.eq.s32.totalorder %s198_s13, 0  ;;  %p212_p2 = scmp.eq.s32.totalorder %s3837_s9, 1 }
   0x7   : > { %p217_p3 = scmp.ne.s32.totalorder %s3760_s28, %s3756_s27  ;;  %p218_p4 = scmp.eq.s32.totalorder %s3149_s10, 1 }
   0x8   : > { %s3852_s14 = scalar_select %p199_p1, %s3764_s29, %s201_s12  }
   0x9   : > { %p3854_p5 = por %p212_p2, %p211_p0  ;;  %p3858_p6 = por %p218_p4, %p217_p3 }
   0xa   : > { %p3152_p7 = scmp.ge.s32.totalorder %s3768_s30, 1  ;;  %p267_p8 = scmp.lt.s32.totalorder %s3768_s30, 3 }
   0xc   : > { %p268_p9 = pnand %p3152_p7, %p267_p8 }
   0xe   : > { %271 = sbr.rel (%p268_p9) target bundleno = 1037 (0x40d), region = 52 }
  0x13   : > { %v3156_v0 = vld [vmem:[%s5533_s1 + $0x18] sm:$0xff]  ;;  %v3155_v1 = vld [vmem:[%s5533_s1 + $0x10] sm:$0xff]  ;;  %s3153_s21 = sshll.u32 %s3837_s9, 2  ;;  %v3354_v2 = vld [vmem:[%s5533_s1 + $0x48] sm:$0xff]  ;;  %vm377_vm0 = vcmask 130048   ;;  %s299_s12 = sand.u32 1, %s3760_s28  }
  0x14   : > { %488 = vmatpush.msra.mxu0 %v3156_v0  ;;  %3653 = vmatpush.msra.mxu1 %v3156_v0  ;;  %p302_p10 = scmp.lt.s32.totalorder %s3153_s21, 7  ;;  %v3288_v3 = vld [vmem:[%s5533_s1 + $0x38] sm:$0xff]  ;;  %v341_v10 = vld [vmem:[%s5533_s1 + $0x8] sm:$0xff]  ;;  %v3287_v14 = vld [vmem:[%s5533_s1 + $0x30] sm:$0xff]  ;;  %s3090_s19 = scalar_lea.hbm %s5540_s8, %s3837_s9 }
  0x15   : > { %3655 = vmatpush.msra.mxu3 %v3156_v0  ;;  %3654 = vmatpush.msra.mxu2 %v3156_v0  ;;  %v3222_v13 = vld [vmem:[%s5533_s1 + $0x28] sm:$0xff]  ;;  %v3221_v15 = vld [vmem:[%s5533_s1 + $0x20] sm:$0xff]  ;;  %v3552_v39 = vld [vmem:[%s5533_s1 + $0x78] sm:$0xff]  ;;  %s300_s22 = scalar_lea.vmem [#allocation2], %s299_s12  ;;  %s3094_s23 = sshll.u32 %s3090_s19, 4  ;;  %s3095_s23 = int_to_ptr.hbm [resolvable:$true] %s3094_s23 }
  0x16   : > { %489 = vmatpush.msra.mxu0 %v3155_v1  ;;  %3656 = vmatpush.msra.mxu1 %v3155_v1  ;;  %s5696_s21 = smov (!%p302_p10, %s3153_s21), 7  ;;  %v3353_v16 = vld [vmem:[%s5533_s1 + $0x40] sm:$0xff]  ;;  %v3486_v34 = vld [vmem:[%s5533_s1 + $0x68] sm:$0xff]  ;;  %v3420_v40 = vld [vmem:[%s5533_s1 + $0x58] sm:$0xff]  ;;  %s3082_s24 = scalar_lea.sflag [#allocation3], %s299_s12 }
  0x17   : > { %3658 = vmatpush.msra.mxu3 %v3155_v1  ;;  %s3659_s26 = smul.u32 160, %s5696_s21  ;;  %3657 = vmatpush.msra.mxu2 %v3155_v1  ;;  %v340_v17 = vld [vmem:[%s5533_s1] sm:$0xff]  ;;  %v3618_v45 = vld [vmem:[%s5533_s1 + $0x88] sm:$0xff]  ;;  %s3720_s25 = sshra.s32 %s3095_s23, 4  ;;  %s3721_s25 = int_to_ptr.hbm [resolvable:$true] %s3720_s25 }
  0x18   : > { %1494 = vmatpush.msrb.mxu0 %v3354_v2  ;;  %697 = vmatpush.msrb.mxu1 %v341_v10  ;;  %s3726_s17 = scalar_lea.hbm %s5540_s8, 2  ;;  %p3727_p0 = scmp.lt.s32.totalorder %s3721_s25, %s5540_s8 }
  0x19   : > { %1218 = vmatpush.msrb.mxu3 %v3288_v3  ;;  %s3880_s13 = scalar_lea.vmem %s5532_s0, %s3659_s26  ;;  %941 = vmatpush.msrb.mxu2 %v3222_v13  ;;  %s3722_s26 = scalar_lea.hbm %s3721_s25, 1 }
  0x1a   : > { %v342_v4 = vld [vmem:[%s3880_s13 + $0x1] sm:$0xff]  ;;  %v3884_v5 = vld [vmem:[%s3880_s13 + $0xd1] sm:$0xff]  ;;  %1495 = vmatpush.msrb.mxu0 %v3353_v16  ;;  %698 = vmatpush.msrb.mxu1 %v340_v17  ;;  %p3723_p11 = scmp.ne.s32.totalorder %s3721_s25, %s3722_s26  ;;  %p3728_p1 = scmp.lt.s32.totalorder %s3726_s17, %s3722_s26 }
  0x1b   : > { %v3887_v6 = vld [vmem:[%s3880_s13 + $0x1a1] sm:$0xff]  ;;  %3157 = vmatmul.msk.f32.vlgmr.msra.gmra.mxu0 %vm377_vm0, %v342_v4  ;;  %3168 = vmatmul.msk.f32.vlgmr.msra.gmra.mxu1 %vm377_vm0, %v3884_v5  ;;  %v3893_v7 = vld [vmem:[%s3880_s13 + $0x151] sm:$0xff] }
  0x1c   : > { %3179 = vmatmul.msk.f32.vlgmr.msra.gmra.mxu3 %vm377_vm0, %v3887_v6  ;;  %3174 = vmatmul.msk.f32.vlgmr.msra.gmra.mxu2 %vm377_vm0, %v3893_v7  ;;  %v3900_v8 = vld [vmem:[%s3880_s13 + $0x11] sm:$0xff]  ;;  %v3903_v9 = vld [vmem:[%s3880_s13 + $0xe1] sm:$0xff]  ;;  %p3724_p12 = pnand %p3723_p11, %p3854_p5  ;;  %p3729_p2 = por %p3728_p1, %p3727_p0 }
  0x1d   : > { %v3909_v11 = vld [vmem:[%s3880_s13 + $0x1b1] sm:$0xff]  ;;  %v3912_v12 = vld [vmem:[%s3880_s13 + $0x161] sm:$0xff]  ;;  %1219 = vmatpush.msrb.mxu3 %v3287_v14  ;;  %942 = vmatpush.msrb.mxu2 %v3221_v15 }
  0x1e   : > { %v3938_v18 = vld [vmem:[%s3880_s13 + $0x21] sm:$0xff]  ;;  %v3941_v19 = vld [vmem:[%s3880_s13 + $0xf1] sm:$0xff]  ;;  %1770 = vmatpush.msra.mxu1 %v3420_v40  ;;  %2599 = vmatpush.msra.mxu0 %v3618_v45  ;;  %p3725_p13 = pneg %p3724_p12 }
  0x1f   : > { %v366_v20 = vld [vmem:[%s3880_s13 + $0x1e1] sm:$0xff]  ;;  %v3945_v21 = vld [vmem:[%s3880_s13 + $0x171] sm:$0xff]  ;;  %2047 = vmatpush.msra.mxu2 %v3486_v34  ;;  %2323 = vmatpush.msra.mxu3 %v3552_v39 }
  0x20   : > { %v3955_v22 = vld [vmem:[%s3880_s13 + $0x31] sm:$0xff]  ;;  %v3958_v23 = vld [vmem:[%s3880_s13 + $0x101] sm:$0xff]  ;;  %p3730_p3 = pnand %p3729_p2, %p3725_p13 }
  0x21   : > { %v3961_v24 = vld [vmem:[%s3880_s13 + $0x1f1] sm:$0xff]  ;;  %v3964_v25 = vld [vmem:[%s3880_s13 + $0x181] sm:$0xff] }
  0x22   : > { %v3975_v26 = vld [vmem:[%s3880_s13 + $0x41] sm:$0xff]  ;;  %v3978_v27 = vld [vmem:[%s3880_s13 + $0x111] sm:$0xff] }
  0x23   : > { %3158 = vmatmul.msk.f32.gmra.mxu0 %vm377_vm0, %v3900_v8  ;;  %3169 = vmatmul.msk.f32.gmra.mxu1 %vm377_vm0, %v3903_v9  ;;  %v3981_v28 = vld [vmem:[%s3880_s13 + $0x201] sm:$0xff]  ;;  %v3984_v29 = vld [vmem:[%s3880_s13 + $0x191] sm:$0xff] }
  0x24   : > { %3180 = vmatmul.msk.f32.gmra.mxu3 %vm377_vm0, %v3909_v11  ;;  %3175 = vmatmul.msk.f32.gmra.mxu2 %vm377_vm0, %v3912_v12  ;;  %v3995_v30 = vld [vmem:[%s3880_s13 + $0x51] sm:$0xff]  ;;  %v358_v31 = vld [vmem:[%s3880_s13 + $0x141] sm:$0xff] }
  0x25   : > { %v3999_v32 = vld [vmem:[%s3880_s13 + $0x211] sm:$0xff]  ;;  %v796_v33 = vld [vmem:[%s3880_s13 + $0x2] sm:$0xff] }
  0x26   : > { %v4012_v35 = vld [vmem:[%s3880_s13 + $0x61] sm:$0xff]  ;;  %v4019_v38 = vld [vmem:[%s3880_s13 + $0x12] sm:$0xff] }
  0x27   : > { %v308_v36 = vld [vmem:[%s3880_s13] sm:$0xff]  ;;  %v4035_v41 = vld [vmem:[%s3880_s13 + $0x71] sm:$0xff] }
  0x28   : > { %v4016_v37 = vld [vmem:[%s3880_s13 + $0x221] sm:$0xff]  ;;  %v309_v42 = vld [vmem:[%s3880_s13 + $0x10] sm:$0xff] }
  0x29   : > { %v4039_v43 = vld [vmem:[%s3880_s13 + $0x231] sm:$0xff]  ;;  %v4042_v44 = vld [vmem:[%s3880_s13 + $0x22] sm:$0xff] }
  0x2a   : > { %v350_v46 = vld [vmem:[%s3880_s13 + $0xa1] sm:$0xff]  ;;  %v4062_v49 = vld [vmem:[%s3880_s13 + $0x32] sm:$0xff] }
  0x2b   : > { %3159 = vmatmul.msk.f32.gmra.mxu0 %vm377_vm0, %v3938_v18  ;;  %3170 = vmatmul.msk.f32.gmra.mxu1 %vm377_vm0, %v3941_v19  ;;  %v4056_v47 = vld [vmem:[%s3880_s13 + $0x20] sm:$0xff]  ;;  %v4072_v50 = vld [vmem:[%s3880_s13 + $0xb1] sm:$0xff] }
  0x2c   : > { %3181 = vmatmul.msk.f32.gmra.mxu3 %vm377_vm0, %v366_v20  ;;  %3176 = vmatmul.msk.f32.gmra.mxu2 %vm377_vm0, %v3945_v21  ;;  %v4059_v48 = vld [vmem:[%s3880_s13 + $0x241] sm:$0xff]  ;;  %v4075_v51 = vld [vmem:[%s3880_s13 + $0x30] sm:$0xff] }
  0x2d   : > { %v4078_v52 = vld [vmem:[%s3880_s13 + $0x251] sm:$0xff]  ;;  %v4081_v53 = vld [vmem:[%s3880_s13 + $0x42] sm:$0xff] }
  0x2e   : > { %v4092_v54 = vld [vmem:[%s3880_s13 + $0xc1] sm:$0xff]  ;;  %v4098_v56 = vld [vmem:[%s3880_s13 + $0x52] sm:$0xff] }
  0x2f   : > { %v4095_v55 = vld [vmem:[%s3880_s13 + $0x40] sm:$0xff]  ;;  %v4108_v57 = vld [vmem:[%s3880_s13 + $0x50] sm:$0xff] }
  0x30   : > { %v4111_v58 = vld [vmem:[%s3880_s13 + $0x62] sm:$0xff]  ;;  %v4125_v60 = vld [vmem:[%s3880_s13 + $0x72] sm:$0xff] }
  0x31   : > { %v4122_v59 = vld [vmem:[%s3880_s13 + $0x60] sm:$0xff]  ;;  %v4136_v61 = vld [vmem:[%s3880_s13 + $0x70] sm:$0xff] }
  0x32   : > { %v804_v62 = vld [vmem:[%s3880_s13 + $0xa2] sm:$0xff]  ;;  %v4148_v0 = vld [vmem:[%s3880_s13 + $0xb2] sm:$0xff] }
  0x33   : > { %3160 = vmatmul.msk.f32.gmra.mxu0 %vm377_vm0, %v3955_v22  ;;  %3171 = vmatmul.msk.f32.gmra.mxu1 %vm377_vm0, %v3958_v23  ;;  %v316_v63 = vld [vmem:[%s3880_s13 + $0xa0] sm:$0xff]  ;;  %v317_v1 = vld [vmem:[%s3880_s13 + $0xb0] sm:$0xff] }
  0x34   : > { %3182 = vmatmul.msk.f32.gmra.mxu3 %vm377_vm0, %v3961_v24  ;;  %3177 = vmatmul.msk.f32.gmra.mxu2 %vm377_vm0, %v3964_v25  ;;  %v4159_v2 = vld [vmem:[%s3880_s13 + $0xc2] sm:$0xff]  ;;  %v4176_v10 = vld [vmem:[%s3880_s13 + $0xd2] sm:$0xff] }
  0x35   : > { %5563 = vst [vmem:[#allocation5_spill] sm:$0xff] %v4159_v2  ;;  %v4195_v17 = vld [vmem:[%s3880_s13 + $0xd0] sm:$0xff]  ;;  %v4201_v20 = vld [vmem:[%s3880_s13 + $0xe2] sm:$0xff] }
  0x36   : > { %5564 = vst [vmem:[#allocation6_spill] sm:$0xff] %v4176_v10  ;;  %v4223_v34 = vld [vmem:[%s3880_s13 + $0x81] sm:$0xff] }
  0x37   : > { %5566 = vst [vmem:[#allocation8_spill] sm:$0xff] %v4195_v17  ;;  %v4247_v45 = vld [vmem:[%s3880_s13 + $0x102] sm:$0xff] }
  0x38   : > { %5567 = vst [vmem:[#allocation9_spill] sm:$0xff] %v4201_v20 }
  0x39   : > { %5570 = vst [vmem:[#allocation12_spill] sm:$0xff] %v4223_v34 }
  0x3a   : > { %5574 = vst [vmem:[#allocation16_spill] sm:$0xff] %v4247_v45 }
  0x3b   : > { %3161 = vmatmul.msk.f32.gmra.mxu0 %vm377_vm0, %v3975_v26  ;;  %3172 = vmatmul.msk.f32.gmra.mxu1 %vm377_vm0, %v3978_v27 }
  0x3c   : > { %3183 = vmatmul.msk.f32.gmra.mxu3 %vm377_vm0, %v3981_v28  ;;  %3178 = vmatmul.msk.f32.gmra.mxu2 %vm377_vm0, %v3984_v29 }
  0x43   : > { %3162 = vmatmul.msk.f32.gmra.mxu0 %vm377_vm0, %v3995_v30  ;;  %3173 = vmatmul.msk.f32.gmra.mxu1 %vm377_vm0, %v358_v31 }
  0x44   : > { %3184 = vmatmul.msk.f32.gmra.mxu3 %vm377_vm0, %v3999_v32  ;;  %3223 = vmatmul.msk.f32.vlgmr.msrb.gmra.mxu2 %vm377_vm0, %v796_v33  ;;  %v4220_v33 = vld [vmem:[%s3880_s13 + $0xe0] sm:$0xff] }
  0x45   : > { %5569 = vst [vmem:[#allocation11_spill] sm:$0xff] %v4220_v33 }
  0x4b   : > { %3163 = vmatmul.msk.f32.gmra.mxu0 %vm377_vm0, %v4012_v35  ;;  %3189 = vmatmul.msk.f32.vlgmr.msrb.gmra.mxu1 %vm377_vm0, %v308_v36 }
  0x4c   : > { %3185 = vmatmul.msk.f32.gmra.mxu3 %vm377_vm0, %v4016_v37  ;;  %3224 = vmatmul.msk.f32.gmra.mxu2 %vm377_vm0, %v4019_v38 }
  0x53   : > { %3164 = vmatmul.msk.f32.gmra.mxu0 %vm377_vm0, %v4035_v41  ;;  %3190 = vmatmul.msk.f32.gmra.mxu1 %vm377_vm0, %v309_v42 }
  0x54   : > { %3186 = vmatmul.msk.f32.gmra.mxu3 %vm377_vm0, %v4039_v43  ;;  %3225 = vmatmul.msk.f32.gmra.mxu2 %vm377_vm0, %v4042_v44 }
  0x5b   : > { %3165 = vmatmul.msk.f32.gmra.mxu0 %vm377_vm0, %v350_v46  ;;  %3191 = vmatmul.msk.f32.gmra.mxu1 %vm377_vm0, %v4056_v47 }
  0x5c   : > { %3187 = vmatmul.msk.f32.gmra.mxu3 %vm377_vm0, %v4059_v48  ;;  %3226 = vmatmul.msk.f32.gmra.mxu2 %vm377_vm0, %v4062_v49 }
  0x63   : > { %3166 = vmatmul.msk.f32.gmra.mxu0 %vm377_vm0, %v4072_v50  ;;  %3192 = vmatmul.msk.f32.gmra.mxu1 %vm377_vm0, %v4075_v51 }
  0x64   : > { %3188 = vmatmul.msk.f32.gmra.mxu3 %vm377_vm0, %v4078_v52  ;;  %3227 = vmatmul.msk.f32.gmra.mxu2 %vm377_vm0, %v4081_v53 }
  0x6b   : > { %3167 = vmatmul.msk.f32.gmra.mxu0 %vm377_vm0, %v4092_v54  ;;  %3193 = vmatmul.msk.f32.gmra.mxu1 %vm377_vm0, %v4095_v55 }
  0x6c   : > { %3289 = vmatmul.msk.f32.vlgmr.msrb.gmra.mxu3 %vm377_vm0, %v309_v42  ;;  %3228 = vmatmul.msk.f32.gmra.mxu2 %vm377_vm0, %v4098_v56  ;;  %v4244_v42 = vld [vmem:[%s3880_s13 + $0xf0] sm:$0xff] }
  0x6d   : > { %5573 = vst [vmem:[#allocation15_spill] sm:$0xff] %v4244_v42 }
  0x73   : > { %3194 = vmatmul.msk.f32.gmra.mxu1 %vm377_vm0, %v4108_v57  ;;  %3355 = vmatmul.msk.f32.vlgmr.msrb.gmra.mxu0 %vm377_vm0, %v3900_v8  ;;  %v4173_v8 = vld [vmem:[%s3880_s13 + $0xc0] sm:$0xff] }
  0x74   : > { %3290 = vmatmul.msk.f32.gmra.mxu3 %vm377_vm0, %v4056_v47  ;;  %3229 = vmatmul.msk.f32.gmra.mxu2 %vm377_vm0, %v4111_v58 }
  0x7b   : > { %3195 = vmatmul.msk.f32.gmra.mxu1 %vm377_vm0, %v4122_v59  ;;  %3356 = vmatmul.msk.f32.gmra.mxu0 %vm377_vm0, %v3938_v18  ;;  %v4198_v18 = vld [vmem:[%s3880_s13 + $0x80] sm:$0xff] }
  0x7c   : > { %3291 = vmatmul.msk.f32.gmra.mxu3 %vm377_vm0, %v4075_v51  ;;  %3230 = vmatmul.msk.f32.gmra.mxu2 %vm377_vm0, %v4125_v60 }
  0x83   : > { %3196 = vmatmul.msk.f32.gmra.mxu1 %vm377_vm0, %v4136_v61  ;;  %3357 = vmatmul.msk.f32.gmra.mxu0 %vm377_vm0, %v3955_v22 }
  0x84   : > { %3292 = vmatmul.msk.f32.gmra.mxu3 %vm377_vm0, %v4095_v55  ;;  %3231 = vmatmul.msk.f32.gmra.mxu2 %vm377_vm0, %v804_v62 }
  0x8b   : > { %3197 = vmatmul.msk.f32.gmra.mxu1 %vm377_vm0, %v316_v63  ;;  %3358 = vmatmul.msk.f32.gmra.mxu0 %vm377_vm0, %v3975_v26 }
  0x8c   : > { %3293 = vmatmul.msk.f32.gmra.mxu3 %vm377_vm0, %v4108_v57  ;;  %3232 = vmatmul.msk.f32.gmra.mxu2 %vm377_vm0, %v4148_v0 }
  0x93   : > { %3198 = vmatmul.msk.f32.gmra.mxu1 %vm377_vm0, %v317_v1  ;;  %3359 = vmatmul.msk.f32.gmra.mxu0 %vm377_vm0, %v3995_v30 }
  0x94   : > { %3294 = vmatmul.msk.f32.gmra.mxu3 %vm377_vm0, %v4122_v59  ;;  %3233 = vmatmul.msk.f32.gmra.mxu2 %vm377_vm0, %v4159_v2 }
  0x98   : > { %v4168_v3 = vpop.f32.mrf.mxu0  ;;  %v4170_v4 = vpop.f32.mrf.mxu1 }
  0x9b   : > { %3199 = vmatmul.msk.f32.gmra.mxu1 %vm377_vm0, %v4173_v8  ;;  %3360 = vmatmul.msk.f32.gmra.mxu0 %vm377_vm0, %v4012_v35  ;;  %v4226_v35 = vld [vmem:[%s3880_s13 + $0xf2] sm:$0xff] }
  0x9c   : > { %3295 = vmatmul.msk.f32.gmra.mxu3 %vm377_vm0, %v4136_v61  ;;  %3234 = vmatmul.msk.f32.gmra.mxu2 %vm377_vm0, %v4176_v10  ;;  %5571 = vst [vmem:[#allocation13_spill] sm:$0xff] %v4226_v35 }
  0x9f   : > { %v4186_v13 = vpop.f32.mrf.mxu3  ;;  %v4188_v14 = vpop.f32.mrf.mxu2 }
  0xa0   : > { %5565 = vst [vmem:[#allocation7_spill] sm:$0xff] %v4186_v13  ;;  %v4190_v15 = vpop.f32.mrf.mxu0  ;;  %v4192_v16 = vpop.f32.mrf.mxu1  ;;  %v324_v13 = vld [vmem:[%s3880_s13 + $0x140] sm:$0xff] }
  0xa3   : > { %3200 = vmatmul.msk.f32.gmra.mxu1 %vm377_vm0, %v4195_v17  ;;  %3361 = vmatmul.msk.f32.gmra.mxu0 %vm377_vm0, %v4035_v41 }
  0xa4   : > { %3296 = vmatmul.msk.f32.gmra.mxu3 %vm377_vm0, %v4198_v18  ;;  %3235 = vmatmul.msk.f32.gmra.mxu2 %vm377_vm0, %v4201_v20 }
  0xa7   : > { %v4211_v22 = vpop.f32.mrf.mxu3  ;;  %v4213_v26 = vpop.f32.mrf.mxu2 }
  0xa8   : > { %5568 = vst [vmem:[#allocation10_spill] sm:$0xff] %v4211_v22  ;;  %v4215_v30 = vpop.f32.mrf.mxu0  ;;  %v4217_v31 = vpop.f32.mrf.mxu1  ;;  %v4288_v22 = vld [vmem:[%s3880_s13 + $0x110] sm:$0xff] }
  0xa9   : > { %5580 = vst [vmem:[#allocation22_spill] sm:$0xff] %v4288_v22 }
  0xab   : > { %3201 = vmatmul.msk.f32.gmra.mxu1 %vm377_vm0, %v4220_v33  ;;  %3362 = vmatmul.msk.f32.gmra.mxu0 %vm377_vm0, %v4223_v34  ;;  %v812_v34 = vld [vmem:[%s3880_s13 + $0x142] sm:$0xff] }
  0xac   : > { %3297 = vmatmul.msk.f32.gmra.mxu3 %vm377_vm0, %v317_v1  ;;  %3236 = vmatmul.msk.f32.gmra.mxu2 %vm377_vm0, %v4226_v35  ;;  %v4266_v35 = vld [vmem:[%s3880_s13 + $0x100] sm:$0xff] }
  0xad   : > { %5576 = vst [vmem:[#allocation18_spill] sm:$0xff] %v4266_v35 }
  0xaf   : > { %v4235_v36 = vpop.f32.mrf.mxu3  ;;  %v4237_v39 = vpop.f32.mrf.mxu2 }
  0xb0   : > { %5572 = vst [vmem:[#allocation14_spill] sm:$0xff] %v4235_v36  ;;  %v4239_v40 = vpop.f32.mrf.mxu0  ;;  %v4241_v41 = vpop.f32.mrf.mxu1  ;;  %v4269_v36 = vld [vmem:[%s3880_s13 + $0x112] sm:$0xff] }
  0xb1   : > { %5577 = vst [vmem:[#allocation19_spill] sm:$0xff] %v4269_v36 }
  0xb3   : > { %3202 = vmatmul.msk.f32.gmra.mxu1 %vm377_vm0, %v4244_v42  ;;  %3363 = vmatmul.msk.f32.gmra.mxu0 %vm377_vm0, %v4072_v50 }
  0xb4   : > { %3298 = vmatmul.msk.f32.gmra.mxu3 %vm377_vm0, %v4173_v8  ;;  %3237 = vmatmul.msk.f32.gmra.mxu2 %vm377_vm0, %v4247_v45 }
  0xb7   : > { %v4257_v46 = vpop.f32.mrf.mxu3  ;;  %v4259_v62 = vpop.f32.mrf.mxu2 }
  0xb8   : > { %5575 = vst [vmem:[#allocation17_spill] sm:$0xff] %v4257_v46  ;;  %v4261_v63 = vpop.f32.mrf.mxu0  ;;  %v4263_v1 = vpop.f32.mrf.mxu1 }
  0xbb   : > { %3203 = vmatmul.msk.f32.gmra.mxu1 %vm377_vm0, %v4266_v35  ;;  %3364 = vmatmul.msk.f32.gmra.mxu0 %vm377_vm0, %v4092_v54 }
  0xbc   : > { %3299 = vmatmul.msk.f32.gmra.mxu3 %vm377_vm0, %v4195_v17  ;;  %3238 = vmatmul.msk.f32.gmra.mxu2 %vm377_vm0, %v4269_v36 }
  0xbf   : > { %v4279_v50 = vpop.f32.mrf.mxu3  ;;  %v4281_v45 = vpop.f32.mrf.mxu2 }
  0xc0   : > { %5578 = vst [vmem:[#allocation20_spill] sm:$0xff] %v4279_v50  ;;  %v4283_v46 = vpop.f32.mrf.mxu0  ;;  %v4285_v20 = vpop.f32.mrf.mxu1 }
  0xc1   : > { %5579 = vst [vmem:[#allocation21_spill] sm:$0xff] %v4281_v45  ;;  %v4305_v45 = vld [vmem:[%s3880_s13 + $0x152] sm:$0xff] }
  0xc2   : > { %5582 = vst [vmem:[#allocation24_spill] sm:$0xff] %v4305_v45 }
  0xc3   : > { %3204 = vmatmul.msk.f32.gmra.mxu1 %vm377_vm0, %v4288_v22  ;;  %3365 = vmatmul.msk.f32.gmra.mxu0 %vm377_vm0, %v3884_v5  ;;  %v3485_v5 = vld [vmem:[%s5533_s1 + $0x60] sm:$0xff] }
  0xc4   : > { %3300 = vmatmul.msk.f32.gmra.mxu3 %vm377_vm0, %v4220_v33  ;;  %3239 = vmatmul.msk.f32.gmra.mxu2 %vm377_vm0, %v812_v34 }
  0xc5   : > { %2048 = vmatpush.msra.mxu2 %v3485_v5 }
  0xc7   : > { %v4298_v54 = vpop.f32.mrf.mxu3  ;;  %v944_v36 = vpop.f32.mrf.mxu2 }
  0xc8   : > { %5581 = vst [vmem:[#allocation23_spill] sm:$0xff] %v4298_v54  ;;  %v4300_v50 = vpop.f32.mrf.mxu0  ;;  %v700_v10 = vpop.f32.mrf.mxu1 }
  0xc9   : > { %v701_v2 = vadd.f32 %v700_v10, %v4168_v3  ;;  %v3551_v3 = vld [vmem:[%s5533_s1 + $0x70] sm:$0xff] }
  0xca   : > { %2324 = vmatpush.msra.mxu3 %v3551_v3  ;;  %v3617_v3 = vld [vmem:[%s5533_s1 + $0x80] sm:$0xff] }
  0xcb   : > { %v4310_v33 = vadd.f32 %v944_v36, %v701_v2  ;;  %3205 = vmatmul.msk.f32.gmra.mxu1 %vm377_vm0, %v324_v13  ;;  %3366 = vmatmul.msk.f32.gmra.mxu0 %vm377_vm0, %v3903_v9  ;;  %v3419_v2 = vld [vmem:[%s5533_s1 + $0x50] sm:$0xff] }
  0xcc   : > { %3301 = vmatmul.msk.f32.gmra.mxu3 %vm377_vm0, %v4244_v42  ;;  %3240 = vmatmul.msk.f32.gmra.mxu2 %vm377_vm0, %v4305_v45  ;;  %v325_v36 = vld [vmem:[%s3880_s13 + $0x150] sm:$0xff]  ;;  %v4332_v45 = vld [vmem:[%s3880_s13 + $0x162] sm:$0xff] }
  0xcd   : > { %1771 = vmatpush.msra.mxu1 %v3419_v2  ;;  %5584 = vst [vmem:[#allocation26_spill] sm:$0xff] %v4332_v45  ;;  %2600 = vmatpush.msra.mxu0 %v3617_v3  ;;  %v4397_v42 = vld [vmem:[%s3880_s13 + $0x192] sm:$0xff] }
  0xce   : > { %5592 = vst [vmem:[#allocation34_spill] sm:$0xff] %v4397_v42 }
  0xcf   : > { %v4325_v10 = vpop.f32.mrf.mxu3  ;;  %v947_v13 = vpop.f32.mrf.mxu2 }
  0xd0   : > { %5583 = vst [vmem:[#allocation25_spill] sm:$0xff] %v4325_v10  ;;  %v4327_v9 = vpop.f32.mrf.mxu0  ;;  %v703_v34 = vpop.f32.mrf.mxu1  ;;  %v4353_v10 = vld [vmem:[%s3880_s13 + $0x172] sm:$0xff] }
  0xd1   : > { %v704_v5 = vadd.f32 %v703_v34, %v4190_v15  ;;  %5586 = vst [vmem:[#allocation28_spill] sm:$0xff] %v4353_v10 }
  0xd3   : > { %v1041_v54 = vadd.f32 %v947_v13, %v704_v5  ;;  %3206 = vmatmul.msk.f32.gmra.mxu1 %vm377_vm0, %v325_v36  ;;  %3367 = vmatmul.msk.f32.gmra.mxu0 %vm377_vm0, %v3941_v19  ;;  %v4349_v19 = vld [vmem:[%s3880_s13 + $0x160] sm:$0xff] }
  0xd4   : > { %3302 = vmatmul.msk.f32.gmra.mxu3 %vm377_vm0, %v4266_v35  ;;  %3241 = vmatmul.msk.f32.gmra.mxu2 %vm377_vm0, %v4332_v45  ;;  %v4375_v35 = vld [vmem:[%s3880_s13 + $0x182] sm:$0xff] }
  0xd5   : > { %5589 = vst [vmem:[#allocation31_spill] sm:$0xff] %v4375_v35 }
  0xd7   : > { %v4344_v15 = vpop.f32.mrf.mxu3  ;;  %v950_v2 = vpop.f32.mrf.mxu2 }
  0xd8   : > { %5585 = vst [vmem:[#allocation27_spill] sm:$0xff] %v4344_v15  ;;  %v4346_v13 = vpop.f32.mrf.mxu0  ;;  %v706_v34 = vpop.f32.mrf.mxu1 }
  0xd9   : > { %v707_v5 = vadd.f32 %v706_v34, %v4215_v30  ;;  %v4368_v34 = vld [vmem:[%s3880_s13 + $0x170] sm:$0xff] }
  0xdb   : > { %v1042_v45 = vadd.f32 %v950_v2, %v707_v5  ;;  %3207 = vmatmul.msk.f32.gmra.mxu1 %vm377_vm0, %v4349_v19  ;;  %3368 = vmatmul.msk.f32.gmra.mxu0 %vm377_vm0, %v3958_v23  ;;  %v4372_v23 = vld [vmem:[%s3880_s13 + $0x120] sm:$0xff] }
  0xdc   : > { %3303 = vmatmul.msk.f32.gmra.mxu3 %vm377_vm0, %v4288_v22  ;;  %3242 = vmatmul.msk.f32.gmra.mxu2 %vm377_vm0, %v4353_v10  ;;  %5588 = vst [vmem:[#allocation30_spill] sm:$0xff] %v4372_v23 }
  0xdf   : > { %v4363_v3 = vpop.f32.mrf.mxu3  ;;  %v953_v15 = vpop.f32.mrf.mxu2 }
  0xe0   : > { %5587 = vst [vmem:[#allocation29_spill] sm:$0xff] %v4363_v3  ;;  %v4365_v30 = vpop.f32.mrf.mxu0  ;;  %v709_v2 = vpop.f32.mrf.mxu1 }
  0xe1   : > { %v710_v5 = vadd.f32 %v709_v2, %v4239_v40 }
  0xe3   : > { %v1043_v22 = vadd.f32 %v953_v15, %v710_v5  ;;  %3208 = vmatmul.msk.f32.gmra.mxu1 %vm377_vm0, %v4368_v34  ;;  %3369 = vmatmul.msk.f32.gmra.mxu0 %vm377_vm0, %v3978_v27  ;;  %v4390_v15 = vld [vmem:[%s3880_s13 + $0x180] sm:$0xff] }
  0xe4   : > { %3304 = vmatmul.msk.f32.gmra.mxu3 %vm377_vm0, %v4372_v23  ;;  %3243 = vmatmul.msk.f32.gmra.mxu2 %vm377_vm0, %v4375_v35  ;;  %v4393_v5 = vld [vmem:[%s3880_s13 + $0x121] sm:$0xff] }
  0xe5   : > { %5591 = vst [vmem:[#allocation33_spill] sm:$0xff] %v4393_v5 }
  0xe7   : > { %v4385_v10 = vpop.f32.mrf.mxu3  ;;  %v956_v40 = vpop.f32.mrf.mxu2 }
  0xe8   : > { %5590 = vst [vmem:[#allocation32_spill] sm:$0xff] %v4385_v10  ;;  %v4387_v2 = vpop.f32.mrf.mxu0  ;;  %v712_v3 = vpop.f32.mrf.mxu1 }
  0xe9   : > { %v713_v27 = vadd.f32 %v712_v3, %v4261_v63 }
  0xeb   : > { %v1044_v23 = vadd.f32 %v956_v40, %v713_v27  ;;  %3209 = vmatmul.msk.f32.gmra.mxu1 %vm377_vm0, %v4390_v15  ;;  %3370 = vmatmul.msk.f32.gmra.mxu0 %vm377_vm0, %v4393_v5  ;;  %v4412_v40 = vld [vmem:[%s3880_s13 + $0x190] sm:$0xff]  ;;  %v4416_v5 = vld [vmem:[%s3880_s13 + $0x1a2] sm:$0xff] }
  0xec   : > { %3305 = vmatmul.msk.f32.gmra.mxu3 %vm377_vm0, %v325_v36  ;;  %3244 = vmatmul.msk.f32.gmra.mxu2 %vm377_vm0, %v4397_v42  ;;  %5594 = vst [vmem:[#allocation36_spill] sm:$0xff] %v4416_v5 }
  0xef   : > { %v1221_v35 = vpop.f32.mrf.mxu3  ;;  %v959_v10 = vpop.f32.mrf.mxu2 }
  0xf0   : > { %v4407_v17 = vadd.f32 %v1221_v35, %v4310_v33  ;;  %v715_v63 = vpop.f32.mrf.mxu1  ;;  %v4409_v3 = vpop.f32.mrf.mxu0 }
  0xf1   : > { %5593 = vst [vmem:[#allocation35_spill] sm:$0xff] %v4409_v3  ;;  %v716_v27 = vadd.f32 %v715_v63, %v4283_v46 }
  0xf3   : > { %v1045_v36 = vadd.f32 %v959_v10, %v716_v27  ;;  %3210 = vmatmul.msk.f32.gmra.mxu1 %vm377_vm0, %v4412_v40  ;;  %3371 = vmatmul.msk.f32.gmra.mxu0 %vm377_vm0, %v3893_v7  ;;  %v4431_v10 = vld [vmem:[%s3880_s13 + $0x1a0] sm:$0xff]  ;;  %v819_v7 = vld [vmem:[%s3880_s13 + $0x1b2] sm:$0xff] }
  0xf4   : > { %3306 = vmatmul.msk.f32.gmra.mxu3 %vm377_vm0, %v4349_v19  ;;  %3245 = vmatmul.msk.f32.gmra.mxu2 %vm377_vm0, %v4416_v5 }
  0xf7   : > { %v1224_v33 = vpop.f32.mrf.mxu3  ;;  %v962_v35 = vpop.f32.mrf.mxu2 }
  0xf8   : > { %v4426_v42 = vadd.f32 %v1224_v33, %v1041_v54  ;;  %v718_v46 = vpop.f32.mrf.mxu1  ;;  %v4428_v63 = vpop.f32.mrf.mxu0 }
  0xf9   : > { %5595 = vst [vmem:[#allocation37_spill] sm:$0xff] %v4428_v63  ;;  %v719_v27 = vadd.f32 %v718_v46, %v4300_v50 }
  0xfb   : > { %v1046_v3 = vadd.f32 %v962_v35, %v719_v27  ;;  %3211 = vmatmul.msk.f32.gmra.mxu1 %vm377_vm0, %v4431_v10  ;;  %3372 = vmatmul.msk.f32.gmra.mxu0 %vm377_vm0, %v3912_v12  ;;  %v4447_v35 = vld [vmem:[%s3880_s13 + $0x1b0] sm:$0xff]  ;;  %v820_v27 = vld [vmem:[%s3880_s13 + $0x1e2] sm:$0xff] }
  0xfc   : > { %3307 = vmatmul.msk.f32.gmra.mxu3 %vm377_vm0, %v4368_v34  ;;  %3246 = vmatmul.msk.f32.gmra.mxu2 %vm377_vm0, %v819_v7 }
  0xff   : > { %v1227_v54 = vpop.f32.mrf.mxu3  ;;  %v965_v33 = vpop.f32.mrf.mxu2 }
 0x100   : > { %v4442_v5 = vadd.f32 %v1227_v54, %v1042_v45  ;;  %v721_v63 = vpop.f32.mrf.mxu1  ;;  %v4444_v50 = vpop.f32.mrf.mxu0 }
 0x101   : > { %5597 = vst [vmem:[#allocation39_spill] sm:$0xff] %v4444_v50  ;;  %v722_v46 = vadd.f32 %v721_v63, %v4327_v9  ;;  %v332_v63 = vld [vmem:[%s3880_s13 + $0x1e0] sm:$0xff] }
 0x102   : > { %5596 = vst [vmem:[#allocation38_spill] sm:$0xff] %v4442_v5 }
 0x103   : > { %v1047_v12 = vadd.f32 %v965_v33, %v722_v46  ;;  %3212 = vmatmul.msk.f32.gmra.mxu1 %vm377_vm0, %v4447_v35  ;;  %3373 = vmatmul.msk.f32.gmra.mxu0 %vm377_vm0, %v3945_v21  ;;  %v821_v46 = vld [vmem:[%s3880_s13 + $0x1f2] sm:$0xff] }
 0x104   : > { %3308 = vmatmul.msk.f32.gmra.mxu3 %vm377_vm0, %v4390_v15  ;;  %3247 = vmatmul.msk.f32.gmra.mxu2 %vm377_vm0, %v820_v27 }
 0x107   : > { %v1230_v45 = vpop.f32.mrf.mxu3  ;;  %v968_v7 = vpop.f32.mrf.mxu2 }
 0x108   : > { %v4458_v54 = vadd.f32 %v1230_v45, %v1043_v22  ;;  %v724_v50 = vpop.f32.mrf.mxu1  ;;  %v4460_v9 = vpop.f32.mrf.mxu0 }
 0x109   : > { %5598 = vst [vmem:[#allocation40_spill] sm:$0xff] %v4460_v9  ;;  %v725_v33 = vadd.f32 %v724_v50, %v4346_v13  ;;  %v333_v13 = vld [vmem:[%s3880_s13 + $0x1f0] sm:$0xff] }
 0x10b   : > { %v1048_v5 = vadd.f32 %v968_v7, %v725_v33  ;;  %3213 = vmatmul.msk.f32.gmra.mxu1 %vm377_vm0, %v332_v63  ;;  %3374 = vmatmul.msk.f32.gmra.mxu0 %vm377_vm0, %v3964_v25  ;;  %v822_v7 = vld [vmem:[%s3880_s13 + $0x202] sm:$0xff] }
 0x10c   : > { %3309 = vmatmul.msk.f32.gmra.mxu3 %vm377_vm0, %v4412_v40  ;;  %3248 = vmatmul.msk.f32.gmra.mxu2 %vm377_vm0, %v821_v46 }
 0x10f   : > { %v1233_v21 = vpop.f32.mrf.mxu3  ;;  %v971_v22 = vpop.f32.mrf.mxu2 }
 0x110   : > { %v4471_v27 = vadd.f32 %v1233_v21, %v1044_v23  ;;  %v727_v45 = vpop.f32.mrf.mxu1  ;;  %v4473_v9 = vpop.f32.mrf.mxu0  ;;  %v4489_v21 = vld [vmem:[%s3880_s13 + $0x200] sm:$0xff] }
 0x111   : > { %5600 = vst [vmem:[#allocation42_spill] sm:$0xff] %v4473_v9  ;;  %v728_v50 = vadd.f32 %v727_v45, %v4365_v30  ;;  %v826_v9 = vld [vmem:[%s3880_s13 + $0x242] sm:$0xff] }
 0x112   : > { %5599 = vst [vmem:[#allocation41_spill] sm:$0xff] %v4471_v27 }
 0x113   : > { %v1049_v63 = vadd.f32 %v971_v22, %v728_v50  ;;  %3214 = vmatmul.msk.f32.gmra.mxu1 %vm377_vm0, %v333_v13  ;;  %3375 = vmatmul.msk.f32.gmra.mxu0 %vm377_vm0, %v3984_v29  ;;  %v823_v29 = vld [vmem:[%s3880_s13 + $0x212] sm:$0xff] }
 0x114   : > { %3310 = vmatmul.msk.f32.gmra.mxu3 %vm377_vm0, %v4431_v10  ;;  %3249 = vmatmul.msk.f32.gmra.mxu2 %vm377_vm0, %v822_v7 }
 0x117   : > { %v1236_v25 = vpop.f32.mrf.mxu3  ;;  %v974_v23 = vpop.f32.mrf.mxu2 }
 0x118   : > { %v4484_v33 = vadd.f32 %v1236_v25, %v1045_v36  ;;  %v730_v46 = vpop.f32.mrf.mxu1  ;;  %v4486_v30 = vpop.f32.mrf.mxu0 }
 0x119   : > { %5602 = vst [vmem:[#allocation44_spill] sm:$0xff] %v4486_v30  ;;  %v731_v22 = vadd.f32 %v730_v46, %v4387_v2  ;;  %v4508_v46 = vld [vmem:[%s3880_s13 + $0x1c0] sm:$0xff] }
 0x11a   : > { %5601 = vst [vmem:[#allocation43_spill] sm:$0xff] %v4484_v33  ;;  %v3344_v30 = vld [vmem:[%s3880_s13 + $0x1c1] sm:$0xff]  ;;  %v825_v33 = vld [vmem:[%s3880_s13 + $0x232] sm:$0xff] }
 0x11b   : > { %v1050_v45 = vadd.f32 %v974_v23, %v731_v22  ;;  %3215 = vmatmul.msk.f32.gmra.mxu1 %vm377_vm0, %v4489_v21  ;;  %3376 = vmatmul.msk.f32.gmra.mxu0 %vm377_vm0, %v3887_v6  ;;  %v4505_v23 = vld [vmem:[%s3880_s13 + $0x210] sm:$0xff]  ;;  %v824_v6 = vld [vmem:[%s3880_s13 + $0x222] sm:$0xff] }
 0x11c   : > { %3311 = vmatmul.msk.f32.gmra.mxu3 %vm377_vm0, %v4447_v35  ;;  %3250 = vmatmul.msk.f32.gmra.mxu2 %vm377_vm0, %v823_v29 }
 0x11f   : > { %v1239_v36 = vpop.f32.mrf.mxu3  ;;  %v977_v50 = vpop.f32.mrf.mxu2 }
 0x120   : > { %v4500_v7 = vadd.f32 %v1239_v36, %v1046_v3  ;;  %v733_v2 = vpop.f32.mrf.mxu1  ;;  %v4502_v25 = vpop.f32.mrf.mxu0 }
 0x121   : > { %5604 = vst [vmem:[#allocation46_spill] sm:$0xff] %v4502_v25 }
 0x122   : > { %5603 = vst [vmem:[#allocation45_spill] sm:$0xff] %v4500_v7  ;;  %v4523_v7 = vld [vmem:[%s3880_s13 + $0x220] sm:$0xff] }
 0x123   : > { %3216 = vmatmul.msk.f32.gmra.mxu1 %vm377_vm0, %v4505_v23  ;;  %3377 = vmatmul.msk.f32.gmra.mxu0 %vm377_vm0, %v3909_v11 }
 0x124   : > { %3312 = vmatmul.msk.f32.gmra.mxu3 %vm377_vm0, %v4508_v46  ;;  %3251 = vmatmul.msk.f32.gmra.mxu2 %vm377_vm0, %v824_v6 }
 0x127   : > { %v1242_v3 = vpop.f32.mrf.mxu3  ;;  %v980_v22 = vpop.f32.mrf.mxu2 }
 0x128   : > { %v4518_v29 = vadd.f32 %v1242_v3, %v1047_v12  ;;  %v736_v36 = vpop.f32.mrf.mxu1  ;;  %v4520_v25 = vpop.f32.mrf.mxu0 }
 0x129   : > { %5606 = vst [vmem:[#allocation48_spill] sm:$0xff] %v4520_v25 }
 0x12a   : > { %5605 = vst [vmem:[#allocation47_spill] sm:$0xff] %v4518_v29  ;;  %v337_v29 = vld [vmem:[%s3880_s13 + $0x230] sm:$0xff] }
 0x12b   : > { %3217 = vmatmul.msk.f32.gmra.mxu1 %vm377_vm0, %v4523_v7  ;;  %3378 = vmatmul.msk.f32.gmra.mxu0 %vm377_vm0, %v3344_v30 }
 0x12c   : > { %3313 = vmatmul.msk.f32.gmra.mxu3 %vm377_vm0, %v333_v13  ;;  %3252 = vmatmul.msk.f32.gmra.mxu2 %vm377_vm0, %v825_v33 }
 0x12f   : > { %v1245_v11 = vpop.f32.mrf.mxu3  ;;  %v983_v12 = vpop.f32.mrf.mxu2 }
 0x130   : > { %v4532_v6 = vadd.f32 %v1245_v11, %v1048_v5  ;;  %v739_v3 = vpop.f32.mrf.mxu1  ;;  %v4534_v25 = vpop.f32.mrf.mxu0 }
 0x131   : > { %5608 = vst [vmem:[#allocation50_spill] sm:$0xff] %v4534_v25  ;;  %v338_v25 = vld [vmem:[%s3880_s13 + $0x240] sm:$0xff] }
 0x132   : > { %5607 = vst [vmem:[#allocation49_spill] sm:$0xff] %v4532_v6  ;;  %v827_v6 = vld [vmem:[%s3880_s13 + $0x252] sm:$0xff] }
 0x133   : > { %3218 = vmatmul.msk.f32.gmra.mxu1 %vm377_vm0, %v337_v29  ;;  %3379 = vmatmul.msk.f32.gmra.mxu0 %vm377_vm0, %v3961_v24 }
 0x134   : > { %3314 = vmatmul.msk.f32.gmra.mxu3 %vm377_vm0, %v4489_v21  ;;  %3253 = vmatmul.msk.f32.gmra.mxu2 %vm377_vm0, %v826_v9 }
 0x137   : > { %v1248_v13 = vpop.f32.mrf.mxu3  ;;  %v986_v33 = vpop.f32.mrf.mxu2 }
 0x138   : > { %v4544_v5 = vadd.f32 %v1248_v13, %v1049_v63  ;;  %v742_v30 = vpop.f32.mrf.mxu1  ;;  %v4546_v11 = vpop.f32.mrf.mxu0 }
 0x139   : > { %5610 = vst [vmem:[#allocation52_spill] sm:$0xff] %v4546_v11  ;;  %v339_v11 = vld [vmem:[%s3880_s13 + $0x250] sm:$0xff] }
 0x13a   : > { %5609 = vst [vmem:[#allocation51_spill] sm:$0xff] %v4544_v5  ;;  %v734_v5 = vadd.f32 %v733_v2, %v4170_v4  ;;  %v737_v4 = vadd.f32 %v736_v36, %v4192_v16  ;;  %v740_v16 = vadd.f32 %v739_v3, %v4217_v31  ;;  %v743_v31 = vadd.f32 %v742_v30, %v4241_v41  ;;  %v4610_v30 = vld [vmem:[%s3880_s13 + $0x260] sm:$0xff] }
 0x13b   : > { %3219 = vmatmul.msk.f32.gmra.mxu1 %vm377_vm0, %v338_v25  ;;  %3380 = vmatmul.msk.f32.gmra.mxu0 %vm377_vm0, %v3981_v28 }
 0x13c   : > { %3315 = vmatmul.msk.f32.gmra.mxu3 %vm377_vm0, %v4505_v23  ;;  %3254 = vmatmul.msk.f32.gmra.mxu2 %vm377_vm0, %v827_v6  ;;  %v1051_v28 = vadd.f32 %v977_v50, %v734_v5 }
 0x13f   : > { %v1251_v24 = vpop.f32.mrf.mxu3  ;;  %v989_v9 = vpop.f32.mrf.mxu2 }
 0x140   : > { %v4556_v27 = vadd.f32 %v1251_v24, %v1050_v45  ;;  %v745_v63 = vpop.f32.mrf.mxu1  ;;  %v4558_v13 = vpop.f32.mrf.mxu0 }
 0x141   : > { %5612 = vst [vmem:[#allocation54_spill] sm:$0xff] %v4558_v13 }
 0x142   : > { %5611 = vst [vmem:[#allocation53_spill] sm:$0xff] %v4556_v27 }
 0x143   : > { %3220 = vmatmul.msk.f32.gmra.mxu1 %vm377_vm0, %v339_v11  ;;  %3381 = vmatmul.msk.f32.gmra.mxu0 %vm377_vm0, %v3999_v32  ;;  %v1052_v32 = vadd.f32 %v980_v22, %v737_v4 }
 0x144   : > { %3316 = vmatmul.msk.f32.gmra.mxu3 %vm377_vm0, %v4523_v7  ;;  %3487 = vmatmul.msk.f32.vlgmr.msra.gmra.mxu2 %vm377_vm0, %v4056_v47 }
 0x147   : > { %v1254_v45 = vpop.f32.mrf.mxu3  ;;  %v992_v6 = vpop.f32.mrf.mxu2 }
 0x148   : > { %v4569_v24 = vadd.f32 %v1254_v45, %v1051_v28  ;;  %v748_v13 = vpop.f32.mrf.mxu1  ;;  %v4571_v27 = vpop.f32.mrf.mxu0 }
 0x14b   : > { %3382 = vmatmul.msk.f32.gmra.mxu0 %vm377_vm0, %v4016_v37  ;;  %3421 = vmatmul.msk.f32.vlgmr.msra.gmra.mxu1 %vm377_vm0, %v4019_v38  ;;  %v1053_v37 = vadd.f32 %v983_v12, %v740_v16 }
 0x14c   : > { %3317 = vmatmul.msk.f32.gmra.mxu3 %vm377_vm0, %v337_v29  ;;  %3488 = vmatmul.msk.f32.gmra.mxu2 %vm377_vm0, %v4075_v51 }
 0x14f   : > { %v1257_v47 = vpop.f32.mrf.mxu3  ;;  %v995_v50 = vpop.f32.mrf.mxu2 }
 0x150   : > { %v4581_v2 = vadd.f32 %v1257_v47, %v1052_v32  ;;  %v751_v5 = vpop.f32.mrf.mxu1  ;;  %v4583_v28 = vpop.f32.mrf.mxu0  ;;  %v749_v32 = vadd.f32 %v748_v13, %v4285_v20  ;;  %v3520_v20 = vld [vmem:[%s3880_s13 + $0x31] sm:$0xff] }
 0x151   : > { %v752_v13 = vadd.f32 %v751_v5, %v4188_v14  ;;  %v3521_v5 = vld [vmem:[%s3880_s13 + $0x41] sm:$0xff] }
 0x153   : > { %3383 = vmatmul.msk.f32.gmra.mxu0 %vm377_vm0, %v4039_v43  ;;  %3422 = vmatmul.msk.f32.gmra.mxu1 %vm377_vm0, %v4042_v44  ;;  %v1054_v43 = vadd.f32 %v986_v33, %v743_v31 }
 0x154   : > { %3318 = vmatmul.msk.f32.gmra.mxu3 %vm377_vm0, %v338_v25  ;;  %3489 = vmatmul.msk.f32.gmra.mxu2 %vm377_vm0, %v4095_v55 }
 0x157   : > { %v1260_v38 = vpop.f32.mrf.mxu3  ;;  %v998_v51 = vpop.f32.mrf.mxu2 }
 0x158   : > { %v4593_v22 = vadd.f32 %v1260_v38, %v1053_v37  ;;  %v754_v29 = vpop.f32.mrf.mxu1  ;;  %v4595_v36 = vpop.f32.mrf.mxu0 }
 0x15b   : > { %3384 = vmatmul.msk.f32.gmra.mxu0 %vm377_vm0, %v4059_v48  ;;  %3423 = vmatmul.msk.f32.gmra.mxu1 %vm377_vm0, %v4062_v49  ;;  %v746_v48 = vadd.f32 %v745_v63, %v4263_v1  ;;  %v3352_v63 = vld [vmem:[%s3880_s13 + $0x261] sm:$0xff] }
 0x15c   : > { %3319 = vmatmul.msk.f32.gmra.mxu3 %vm377_vm0, %v339_v11  ;;  %3490 = vmatmul.msk.f32.gmra.mxu2 %vm377_vm0, %v4108_v57 }
 0x15d   : > { %v1055_v57 = vadd.f32 %v989_v9, %v746_v48  ;;  %v755_v48 = vadd.f32 %v754_v29, %v4213_v26  ;;  %v3394_v26 = vld [vmem:[%s3880_s13 + $0x82] sm:$0xff]  ;;  %v3522_v29 = vld [vmem:[%s3880_s13 + $0x51] sm:$0xff] }
 0x15f   : > { %v1263_v55 = vpop.f32.mrf.mxu3  ;;  %v1001_v25 = vpop.f32.mrf.mxu2 }
 0x160   : > { %v4605_v12 = vadd.f32 %v1263_v55, %v1054_v43  ;;  %v757_v3 = vpop.f32.mrf.mxu1  ;;  %v4607_v41 = vpop.f32.mrf.mxu0 }
 0x163   : > { %3385 = vmatmul.msk.f32.gmra.mxu0 %vm377_vm0, %v4078_v52  ;;  %3424 = vmatmul.msk.f32.gmra.mxu1 %vm377_vm0, %v4081_v53  ;;  %v3519_v52 = vld [vmem:[%s3880_s13 + $0x21] sm:$0xff] }
 0x164   : > { %3320 = vmatmul.msk.f32.gmra.mxu3 %vm377_vm0, %v4610_v30  ;;  %3491 = vmatmul.msk.f32.gmra.mxu2 %vm377_vm0, %v4122_v59  ;;  %v1056_v59 = vadd.f32 %v992_v6, %v749_v32 }
 0x167   : > { %v1266_v33 = vpop.f32.mrf.mxu3  ;;  %v1004_v11 = vpop.f32.mrf.mxu2 }
 0x168   : > { %v4621_v45 = vadd.f32 %v1266_v33, %v1055_v57  ;;  %v760_v4 = vpop.f32.mrf.mxu1  ;;  %v4623_v1 = vpop.f32.mrf.mxu0 }
 0x16b   : > { %3386 = vmatmul.msk.f32.gmra.mxu0 %vm377_vm0, %v3352_v63  ;;  %3425 = vmatmul.msk.f32.gmra.mxu1 %vm377_vm0, %v4098_v56 }
 0x16c   : > { %3553 = vmatmul.msk.f32.vlgmr.msra.gmra.mxu3 %vm377_vm0, %v3519_v52  ;;  %3492 = vmatmul.msk.f32.gmra.mxu2 %vm377_vm0, %v4136_v61  ;;  %v1057_v61 = vadd.f32 %v995_v50, %v752_v13 }
 0x16f   : > { %v1269_v9 = vpop.f32.mrf.mxu3  ;;  %v1007_v47 = vpop.f32.mrf.mxu2 }
 0x170   : > { %v4634_v16 = vadd.f32 %v1269_v9, %v1056_v59  ;;  %v763_v37 = vpop.f32.mrf.mxu1  ;;  %v4636_v38 = vpop.f32.mrf.mxu0 }
 0x173   : > { %3426 = vmatmul.msk.f32.gmra.mxu1 %vm377_vm0, %v4111_v58  ;;  %3619 = vmatmul.msk.f32.vlgmr.msra.gmra.mxu0 %vm377_vm0, %v4042_v44  ;;  %v3460_v58 = vld [vmem:[%s3880_s13 + $0x90] sm:$0xff]  ;;  %v1058_v44 = vadd.f32 %v998_v51, %v755_v48 }
 0x174   : > { %3554 = vmatmul.msk.f32.gmra.mxu3 %vm377_vm0, %v3520_v20  ;;  %3493 = vmatmul.msk.f32.gmra.mxu2 %vm377_vm0, %v4198_v18 }
 0x177   : > { %v1272_v6 = vpop.f32.mrf.mxu3  ;;  %v1010_v31 = vpop.f32.mrf.mxu2 }
 0x178   : > { %v4647_v43 = vadd.f32 %v1272_v6, %v1057_v61  ;;  %v766_v55 = vpop.f32.mrf.mxu1  ;;  %v4649_v14 = vpop.f32.mrf.mxu0 }
 0x17b   : > { %3427 = vmatmul.msk.f32.gmra.mxu1 %vm377_vm0, %v4125_v60  ;;  %3620 = vmatmul.msk.f32.gmra.mxu0 %vm377_vm0, %v4062_v49  ;;  %v758_v60 = vadd.f32 %v757_v3, %v4237_v39  ;;  %v3523_v39 = vld [vmem:[%s3880_s13 + $0x61] sm:$0xff]  ;;  %v761_v3 = vadd.f32 %v760_v4, %v4259_v62  ;;  %v3524_v4 = vld [vmem:[%s3880_s13 + $0x71] sm:$0xff] }
 0x17c   : > { %3555 = vmatmul.msk.f32.gmra.mxu3 %vm377_vm0, %v3521_v5  ;;  %3494 = vmatmul.msk.f32.gmra.mxu2 %vm377_vm0, %v3460_v58  ;;  %v3589_v62 = vld [vmem:[%s3880_s13 + $0x62] sm:$0xff] }
 0x17d   : > { %v1059_v49 = vadd.f32 %v1001_v25, %v758_v60  ;;  %v5615_v58 = vld [vmem:[#allocation5_spill] sm:$0xff] }
 0x17f   : > { %v1275_v18 = vpop.f32.mrf.mxu3  ;;  %v1013_v50 = vpop.f32.mrf.mxu2 }
 0x180   : > { %v4660_v57 = vadd.f32 %v1275_v18, %v1058_v44  ;;  %v769_v33 = vpop.f32.mrf.mxu1  ;;  %v4662_v63 = vpop.f32.mrf.mxu0 }
 0x183   : > { %3428 = vmatmul.msk.f32.gmra.mxu1 %vm377_vm0, %v3394_v26  ;;  %3621 = vmatmul.msk.f32.gmra.mxu0 %vm377_vm0, %v4081_v53  ;;  %v5613_v53 = vld [vmem:[#allocation8_spill] sm:$0xff] }
 0x184   : > { %3556 = vmatmul.msk.f32.gmra.mxu3 %vm377_vm0, %v3522_v29  ;;  %3495 = vmatmul.msk.f32.gmra.mxu2 %vm377_vm0, %v4173_v8  ;;  %v1060_v8 = vadd.f32 %v1004_v11, %v761_v3  ;;  %v5619_v3 = vld [vmem:[#allocation12_spill] sm:$0xff] }
 0x187   : > { %v1278_v51 = vpop.f32.mrf.mxu3  ;;  %v1016_v52 = vpop.f32.mrf.mxu2 }
 0x188   : > { %v4673_v32 = vadd.f32 %v1278_v51, %v1059_v49  ;;  %v772_v59 = vpop.f32.mrf.mxu1  ;;  %v4675_v9 = vpop.f32.mrf.mxu0  ;;  %v5617_v49 = vld [vmem:[#allocation7_spill] sm:$0xff] }
 0x189   : > { %v767_v51 = vadd.f32 %v766_v55, %v5617_v49 }
 0x18b   : > { %3429 = vmatmul.msk.f32.gmra.mxu1 %vm377_vm0, %v4148_v0  ;;  %3622 = vmatmul.msk.f32.gmra.mxu0 %vm377_vm0, %v4098_v56  ;;  %v5614_v0 = vld [vmem:[#allocation21_spill] sm:$0xff]  ;;  %v5616_v56 = vld [vmem:[#allocation11_spill] sm:$0xff] }
 0x18c   : > { %3557 = vmatmul.msk.f32.gmra.mxu3 %vm377_vm0, %v3523_v39  ;;  %3496 = vmatmul.msk.f32.gmra.mxu2 %vm377_vm0, %v5613_v53  ;;  %v764_v5 = vadd.f32 %v763_v37, %v5614_v0  ;;  %v3590_v37 = vld [vmem:[%s3880_s13 + $0x72] sm:$0xff]  ;;  %v5618_v39 = vld [vmem:[#allocation6_spill] sm:$0xff]  ;;  %v1062_v53 = vadd.f32 %v1010_v31, %v767_v51 }
 0x18d   : > { %v3526_v0 = vld [vmem:[%s3880_s13 + $0x91] sm:$0xff] }
 0x18e   : > { %v1061_v11 = vadd.f32 %v1007_v47, %v764_v5  ;;  %v5620_v47 = vld [vmem:[#allocation15_spill] sm:$0xff]  ;;  %v5621_v5 = vld [vmem:[#allocation10_spill] sm:$0xff] }
 0x18f   : > { %v1281_v25 = vpop.f32.mrf.mxu3  ;;  %v1019_v20 = vpop.f32.mrf.mxu2  ;;  %v5623_v31 = vld [vmem:[#allocation18_spill] sm:$0xff] }
 0x190   : > { %v4686_v13 = vadd.f32 %v1281_v25, %v1060_v8  ;;  %v775_v61 = vpop.f32.mrf.mxu1  ;;  %v4688_v6 = vpop.f32.mrf.mxu0 }
 0x193   : > { %3430 = vmatmul.msk.f32.gmra.mxu1 %vm377_vm0, %v5615_v58  ;;  %3623 = vmatmul.msk.f32.gmra.mxu0 %vm377_vm0, %v3589_v62  ;;  %v770_v58 = vadd.f32 %v769_v33, %v5621_v5 }
 0x194   : > { %3558 = vmatmul.msk.f32.gmra.mxu3 %vm377_vm0, %v3524_v4  ;;  %3497 = vmatmul.msk.f32.gmra.mxu2 %vm377_vm0, %v5616_v56  ;;  %v5622_v56 = vld [vmem:[#allocation9_spill] sm:$0xff] }
 0x197   : > { %v1284_v48 = vpop.f32.mrf.mxu3  ;;  %v1022_v44 = vpop.f32.mrf.mxu2 }
 0x198   : > { %v4699_v18 = vadd.f32 %v1284_v48, %v1061_v11  ;;  %v778_v29 = vpop.f32.mrf.mxu1  ;;  %v4701_v60 = vpop.f32.mrf.mxu0  ;;  %v1063_v11 = vadd.f32 %v1013_v50, %v770_v58  ;;  %v5626_v50 = vld [vmem:[#allocation22_spill] sm:$0xff] }
 0x19b   : > { %3431 = vmatmul.msk.f32.gmra.mxu1 %vm377_vm0, %v5618_v39  ;;  %3624 = vmatmul.msk.f32.gmra.mxu0 %vm377_vm0, %v3590_v37  ;;  %v3592_v39 = vld [vmem:[%s3880_s13 + $0x92] sm:$0xff] }
 0x19c   : > { %3559 = vmatmul.msk.f32.gmra.mxu3 %vm377_vm0, %v5619_v3  ;;  %3498 = vmatmul.msk.f32.gmra.mxu2 %vm377_vm0, %v5620_v47  ;;  %v3527_v3 = vld [vmem:[%s3880_s13 + $0xc1] sm:$0xff]  ;;  %v5624_v47 = vld [vmem:[#allocation14_spill] sm:$0xff] }
 0x19f   : > { %v1287_v8 = vpop.f32.mrf.mxu3  ;;  %v4712_v25 = vpop.f32.mrf.mxu2 }
 0x1a0   : > { %v4714_v62 = vadd.f32 %v1287_v8, %v1062_v53  ;;  %v781_v55 = vpop.f32.mrf.mxu1  ;;  %v4716_v4 = vpop.f32.mrf.mxu0  ;;  %v5625_v53 = vld [vmem:[#allocation13_spill] sm:$0xff] }
 0x1a3   : > { %3432 = vmatmul.msk.f32.gmra.mxu1 %vm377_vm0, %v5622_v56  ;;  %3625 = vmatmul.msk.f32.gmra.mxu0 %vm377_vm0, %v3394_v26  ;;  %v773_v26 = vadd.f32 %v772_v59, %v5624_v47 }
 0x1a4   : > { %3560 = vmatmul.msk.f32.gmra.mxu3 %vm377_vm0, %v3526_v0  ;;  %3499 = vmatmul.msk.f32.gmra.mxu2 %vm377_vm0, %v5623_v31  ;;  %v3593_v31 = vld [vmem:[%s3880_s13 + $0xc2] sm:$0xff] }
 0x1a5   : > { %v1064_v8 = vadd.f32 %v1016_v52, %v773_v26  ;;  %v5630_v52 = vld [vmem:[#allocation30_spill] sm:$0xff] }
 0x1a7   : > { %v1290_v48 = vpop.f32.mrf.mxu3  ;;  %v4726_v37 = vpop.f32.mrf.mxu2 }
 0x1a8   : > { %v4728_v49 = vadd.f32 %v1290_v48, %v1063_v11  ;;  %v784_v51 = vpop.f32.mrf.mxu1  ;;  %v4730_v33 = vpop.f32.mrf.mxu0  ;;  %v3528_v11 = vld [vmem:[%s3880_s13 + $0xd1] sm:$0xff]  ;;  %v5628_v48 = vld [vmem:[#allocation17_spill] sm:$0xff] }
 0x1ab   : > { %3433 = vmatmul.msk.f32.gmra.mxu1 %vm377_vm0, %v5625_v53  ;;  %3626 = vmatmul.msk.f32.gmra.mxu0 %vm377_vm0, %v3592_v39  ;;  %v776_v39 = vadd.f32 %v775_v61, %v5628_v48  ;;  %v3594_v61 = vld [vmem:[%s3880_s13 + $0xd2] sm:$0xff]  ;;  %v3529_v48 = vld [vmem:[%s3880_s13 + $0xe1] sm:$0xff] }
 0x1ac   : > { %3561 = vmatmul.msk.f32.gmra.mxu3 %vm377_vm0, %v3527_v3  ;;  %3500 = vmatmul.msk.f32.gmra.mxu2 %vm377_vm0, %v5626_v50  ;;  %v5629_v3 = vld [vmem:[#allocation16_spill] sm:$0xff] }
 0x1ad   : > { %v1065_v47 = vadd.f32 %v1019_v20, %v776_v39 }
 0x1af   : > { %v1293_v0 = vpop.f32.mrf.mxu3  ;;  %v4741_v5 = vpop.f32.mrf.mxu2 }
 0x1b0   : > { %v4743_v58 = vadd.f32 %v1293_v0, %v1064_v8  ;;  %v787_v56 = vpop.f32.mrf.mxu1  ;;  %v4745_v59 = vpop.f32.mrf.mxu0 }
 0x1b1   : > { %5627 = vst [vmem:[#allocation8_spill] sm:$0xff] %v4745_v59  ;;  %v5634_v59 = vld [vmem:[#allocation19_spill] sm:$0xff] }
 0x1b3   : > { %3434 = vmatmul.msk.f32.gmra.mxu1 %vm377_vm0, %v5629_v3  ;;  %3627 = vmatmul.msk.f32.gmra.mxu0 %vm377_vm0, %v3593_v31  ;;  %v3468_v31 = vld [vmem:[%s3880_s13 + $0x130] sm:$0xff]  ;;  %v5633_v3 = vld [vmem:[#allocation20_spill] sm:$0xff] }
 0x1b4   : > { %3562 = vmatmul.msk.f32.gmra.mxu3 %vm377_vm0, %v3528_v11  ;;  %3501 = vmatmul.msk.f32.gmra.mxu2 %vm377_vm0, %v5630_v52  ;;  %v779_v11 = vadd.f32 %v778_v29, %v5633_v3  ;;  %v3402_v29 = vld [vmem:[%s3880_s13 + $0x122] sm:$0xff] }
 0x1b5   : > { %v3595_v3 = vld [vmem:[%s3880_s13 + $0xe2] sm:$0xff] }
 0x1b6   : > { %v1066_v20 = vadd.f32 %v1022_v44, %v779_v11 }
 0x1b7   : > { %v1296_v26 = vpop.f32.mrf.mxu3  ;;  %v4756_v53 = vpop.f32.mrf.mxu2 }
 0x1b8   : > { %v4758_v50 = vadd.f32 %v1296_v26, %v1065_v47  ;;  %v790_v8 = vpop.f32.mrf.mxu1  ;;  %v4760_v0 = vpop.f32.mrf.mxu0 }
 0x1b9   : > { %5632 = vst [vmem:[#allocation5_spill] sm:$0xff] %v4760_v0 }
 0x1ba   : > { %5631 = vst [vmem:[#allocation21_spill] sm:$0xff] %v4758_v50  ;;  %v5636_v50 = vld [vmem:[#allocation23_spill] sm:$0xff] }
 0x1bb   : > { %3435 = vmatmul.msk.f32.gmra.mxu1 %vm377_vm0, %v5634_v59  ;;  %3628 = vmatmul.msk.f32.gmra.mxu0 %vm377_vm0, %v3594_v61  ;;  %v3530_v59 = vld [vmem:[%s3880_s13 + $0xf1] sm:$0xff]  ;;  %v782_v61 = vadd.f32 %v781_v55, %v5636_v50 }
 0x1bc   : > { %3563 = vmatmul.msk.f32.gmra.mxu3 %vm377_vm0, %v3529_v48  ;;  %3502 = vmatmul.msk.f32.gmra.mxu2 %vm377_vm0, %v3468_v31  ;;  %v3596_v50 = vld [vmem:[%s3880_s13 + $0xf2] sm:$0xff] }
 0x1bd   : > { %v1067_v44 = vadd.f32 %v4712_v25, %v782_v61 }
 0x1bf   : > { %v1299_v39 = vpop.f32.mrf.mxu3  ;;  %v4771_v52 = vpop.f32.mrf.mxu2 }
 0x1c0   : > { %v4773_v47 = vadd.f32 %v1299_v39, %v1066_v20  ;;  %v793_v26 = vpop.f32.mrf.mxu1  ;;  %v4775_v0 = vpop.f32.mrf.mxu0  ;;  %v3531_v39 = vld [vmem:[%s3880_s13 + $0x101] sm:$0xff] }
 0x1c1   : > { %5635 = vst [vmem:[#allocation11_spill] sm:$0xff] %v4775_v0 }
 0x1c3   : > { %3436 = vmatmul.msk.f32.gmra.mxu1 %vm377_vm0, %v3402_v29  ;;  %3629 = vmatmul.msk.f32.gmra.mxu0 %vm377_vm0, %v3595_v3  ;;  %v5639_v3 = vld [vmem:[#allocation25_spill] sm:$0xff] }
 0x1c4   : > { %3564 = vmatmul.msk.f32.gmra.mxu3 %vm377_vm0, %v3530_v59  ;;  %3503 = vmatmul.msk.f32.gmra.mxu2 %vm377_vm0, %v4349_v19  ;;  %v785_v0 = vadd.f32 %v784_v51, %v5639_v3  ;;  %v5640_v59 = vld [vmem:[#allocation24_spill] sm:$0xff]  ;;  %v3597_v3 = vld [vmem:[%s3880_s13 + $0x102] sm:$0xff] }
 0x1c6   : > { %v1068_v19 = vadd.f32 %v4726_v37, %v785_v0 }
 0x1c7   : > { %v1302_v48 = vpop.f32.mrf.mxu3  ;;  %v4787_v31 = vpop.f32.mrf.mxu2 }
 0x1c8   : > { %v4789_v11 = vadd.f32 %v1302_v48, %v1067_v44  ;;  %v4791_v20 = vpop.f32.mrf.mxu0  ;;  %v1773_v55 = vpop.f32.mrf.mxu1 }
 0x1c9   : > { %5638 = vst [vmem:[#allocation6_spill] sm:$0xff] %v4791_v20 }
 0x1ca   : > { %5637 = vst [vmem:[#allocation7_spill] sm:$0xff] %v4789_v11  ;;  %v5185_v11 = vld [vmem:[%s3880_s13 + $0x262] sm:$0xff] }
 0x1cb   : > { %3437 = vmatmul.msk.f32.gmra.mxu1 %vm377_vm0, %v5640_v59  ;;  %3630 = vmatmul.msk.f32.gmra.mxu0 %vm377_vm0, %v3596_v50  ;;  %v3532_v59 = vld [vmem:[%s3880_s13 + $0x111] sm:$0xff] }
 0x1cc   : > { %3565 = vmatmul.msk.f32.gmra.mxu3 %vm377_vm0, %v3531_v39  ;;  %3504 = vmatmul.msk.f32.gmra.mxu2 %vm377_vm0, %v4368_v34  ;;  %v5643_v50 = vld [vmem:[#allocation27_spill] sm:$0xff]  ;;  %v5644_v39 = vld [vmem:[#allocation26_spill] sm:$0xff] }
 0x1cd   : > { %v788_v20 = vadd.f32 %v787_v56, %v5643_v50  ;;  %v3598_v50 = vld [vmem:[%s3880_s13 + $0x112] sm:$0xff] }
 0x1cf   : > { %v1305_v25 = vpop.f32.mrf.mxu3  ;;  %v4803_v61 = vpop.f32.mrf.mxu2  ;;  %v1069_v34 = vadd.f32 %v4741_v5, %v788_v20  ;;  %v5649_v5 = vld [vmem:[#allocation33_spill] sm:$0xff] }
 0x1d0   : > { %v4805_v44 = vadd.f32 %v1305_v25, %v1068_v19  ;;  %v4807_v48 = vpop.f32.mrf.mxu0  ;;  %v4809_v51 = vpop.f32.mrf.mxu1 }
 0x1d1   : > { %5642 = vst [vmem:[#allocation15_spill] sm:$0xff] %v4807_v48 }
 0x1d2   : > { %5641 = vst [vmem:[#allocation12_spill] sm:$0xff] %v4805_v44  ;;  %v2910_v44 = vld [vmem:[%s5536_s4 + $0x68] sm:$0xff] }
 0x1d3   : > { %3438 = vmatmul.msk.f32.gmra.mxu1 %vm377_vm0, %v5644_v39  ;;  %3631 = vmatmul.msk.f32.gmra.mxu0 %vm377_vm0, %v3597_v3  ;;  %v2928_v3 = vld [vmem:[%s5536_s4 + $0xf8] sm:$0xff] }
 0x1d4   : > { %3566 = vmatmul.msk.f32.gmra.mxu3 %vm377_vm0, %v3532_v59  ;;  %3505 = vmatmul.msk.f32.gmra.mxu2 %vm377_vm0, %v4390_v15  ;;  %v5647_v59 = vld [vmem:[#allocation29_spill] sm:$0xff]  ;;  %v5648_v39 = vld [vmem:[#allocation28_spill] sm:$0xff] }
 0x1d5   : > { %2982 = vmatpush.msrb.mxu2 %v2928_v3  ;;  %v791_v15 = vadd.f32 %v790_v8, %v5647_v59  ;;  %v3534_v59 = vld [vmem:[%s3880_s13 + $0x131] sm:$0xff] }
 0x1d7   : > { %v1308_v37 = vpop.f32.mrf.mxu3  ;;  %v4821_v0 = vpop.f32.mrf.mxu2  ;;  %v1070_v20 = vadd.f32 %v4756_v53, %v791_v15  ;;  %v5653_v53 = vld [vmem:[#allocation31_spill] sm:$0xff] }
 0x1d8   : > { %v4823_v19 = vadd.f32 %v1308_v37, %v1069_v34  ;;  %v4825_v25 = vpop.f32.mrf.mxu0  ;;  %v4827_v56 = vpop.f32.mrf.mxu1 }
 0x1d9   : > { %5646 = vst [vmem:[#allocation9_spill] sm:$0xff] %v4825_v25 }
 0x1da   : > { %5645 = vst [vmem:[#allocation10_spill] sm:$0xff] %v4823_v19 }
 0x1db   : > { %3439 = vmatmul.msk.f32.gmra.mxu1 %vm377_vm0, %v5648_v39  ;;  %3632 = vmatmul.msk.f32.gmra.mxu0 %vm377_vm0, %v3598_v50  ;;  %v5652_v39 = vld [vmem:[#allocation32_spill] sm:$0xff] }
 0x1dc   : > { %3567 = vmatmul.msk.f32.gmra.mxu3 %vm377_vm0, %v5649_v5  ;;  %3506 = vmatmul.msk.f32.gmra.mxu2 %vm377_vm0, %v4412_v40  ;;  %v794_v50 = vadd.f32 %v793_v26, %v5652_v39  ;;  %v2912_v5 = vld [vmem:[%s5536_s4 + $0x78] sm:$0xff] }
 0x1dd   : > { %v2944_v40 = vld [vmem:[%s5536_s4 + $0x178] sm:$0xff]  ;;  %2962 = vmatpush.msrb.mxu1 %v2912_v5 }
 0x1de   : > { %3002 = vmatpush.msrb.mxu3 %v2944_v40  ;;  %v1071_v26 = vadd.f32 %v4771_v52, %v794_v50  ;;  %v2927_v52 = vld [vmem:[%s5536_s4 + $0xf0] sm:$0xff] }
 0x1df   : > { %v1311_v34 = vpop.f32.mrf.mxu3  ;;  %v4842_v37 = vpop.f32.mrf.mxu2  ;;  %v5657_v50 = vld [vmem:[#allocation34_spill] sm:$0xff]  ;;  %2983 = vmatpush.msrb.mxu2 %v2927_v52 }
 0x1e0   : > { %v4844_v25 = vadd.f32 %v1311_v34, %v1070_v20  ;;  %v4846_v3 = vpop.f32.mrf.mxu0  ;;  %v4848_v8 = vpop.f32.mrf.mxu1  ;;  %v5654_v34 = vld [vmem:[#allocation35_spill] sm:$0xff] }
 0x1e1   : > { %5651 = vst [vmem:[#allocation14_spill] sm:$0xff] %v4846_v3  ;;  %v1593_v39 = vadd.f32 %v5654_v34, %v4407_v17 }
 0x1e2   : > { %5650 = vst [vmem:[#allocation18_spill] sm:$0xff] %v4844_v25  ;;  %v3535_v25 = vld [vmem:[%s3880_s13 + $0x161] sm:$0xff] }
 0x1e3   : > { %3440 = vmatmul.msk.f32.gmra.mxu1 %vm377_vm0, %v5653_v53  ;;  %3633 = vmatmul.msk.f32.gmra.mxu0 %vm377_vm0, %v3402_v29 }
 0x1e4   : > { %3568 = vmatmul.msk.f32.gmra.mxu3 %vm377_vm0, %v3534_v59  ;;  %3507 = vmatmul.msk.f32.gmra.mxu2 %vm377_vm0, %v4431_v10  ;;  %v3600_v59 = vld [vmem:[%s3880_s13 + $0x132] sm:$0xff]  ;;  %v1869_v10 = vadd.f32 %v1773_v55, %v1593_v39  ;;  %v5658_v55 = vld [vmem:[#allocation37_spill] sm:$0xff] }
 0x1e6   : > { %v2146_v17 = vadd.f32 %v4787_v31, %v1869_v10  ;;  %v2943_v31 = vld [vmem:[%s5536_s4 + $0x170] sm:$0xff]  ;;  %v5659_v10 = vld [vmem:[#allocation36_spill] sm:$0xff] }
 0x1e7   : > { %v1314_v15 = vpop.f32.mrf.mxu3  ;;  %v4865_v20 = vpop.f32.mrf.mxu2  ;;  %3003 = vmatpush.msrb.mxu3 %v2943_v31  ;;  %v3476_v31 = vld [vmem:[%s3880_s13 + $0x1d0] sm:$0xff] }
 0x1e8   : > { %v4869_v3 = vadd.f32 %v1314_v15, %v1071_v26  ;;  %v4871_v53 = vpop.f32.mrf.mxu0  ;;  %v4873_v29 = vpop.f32.mrf.mxu1  ;;  %v1594_v26 = vadd.f32 %v5658_v55, %v4426_v42  ;;  %v5660_v55 = vld [vmem:[#allocation38_spill] sm:$0xff] }
 0x1e9   : > { %5656 = vst [vmem:[#allocation22_spill] sm:$0xff] %v4871_v53 }
 0x1ea   : > { %5655 = vst [vmem:[#allocation13_spill] sm:$0xff] %v4869_v3 }
 0x1eb   : > { %3441 = vmatmul.msk.f32.gmra.mxu1 %vm377_vm0, %v5657_v50  ;;  %3634 = vmatmul.msk.f32.gmra.mxu0 %vm377_vm0, %v3600_v59  ;;  %v3601_v50 = vld [vmem:[%s3880_s13 + $0x162] sm:$0xff]  ;;  %v3536_v59 = vld [vmem:[%s3880_s13 + $0x171] sm:$0xff] }
 0x1ec   : > { %3569 = vmatmul.msk.f32.gmra.mxu3 %vm377_vm0, %v3535_v25  ;;  %3508 = vmatmul.msk.f32.gmra.mxu2 %vm377_vm0, %v4447_v35  ;;  %v1870_v25 = vadd.f32 %v4809_v51, %v1594_v26  ;;  %v2911_v35 = vld [vmem:[%s5536_s4 + $0x70] sm:$0xff]  ;;  %v4908_v51 = vld [vmem:[%s5534_s2] ss:$0 sm:$0xff] }
 0x1ed   : > { %2963 = vmatpush.msrb.mxu1 %v2911_v35  ;;  %v5661_v26 = vld [vmem:[#allocation39_spill] sm:$0xff] }
 0x1ee   : > { %v2147_v52 = vadd.f32 %v4803_v61, %v1870_v25  ;;  %v4927_v35 = vld [vmem:[%s3880_s13 + $0x1b2] sm:$0xff]  ;;  %v3537_v25 = vld [vmem:[%s3880_s13 + $0x181] sm:$0xff] }
 0x1ef   : > { %v2326_v5 = vpop.f32.mrf.mxu3  ;;  %v4887_v40 = vpop.f32.mrf.mxu2  ;;  %v3602_v61 = vld [vmem:[%s3880_s13 + $0x172] sm:$0xff]  ;;  %2964 = vmatpush.msrb.mxu1 %v2910_v44 }
 0x1f0   : > { %v2422_v15 = vadd.f32 %v2326_v5, %v2146_v17  ;;  %v4891_v34 = vpop.f32.mrf.mxu1  ;;  %v2602_v39 = vpop.f32.mrf.mxu0 }
 0x1f2   : > { %v2698_v42 = vadd.f32 %v2602_v39, %v2422_v15  ;;  %v1595_v15 = vadd.f32 %v5661_v26, %v5660_v55 }
 0x1f3   : > { %3442 = vmatmul.msk.f32.gmra.mxu1 %vm377_vm0, %v5659_v10  ;;  %3635 = vmatmul.msk.f32.gmra.mxu0 %vm377_vm0, %v3601_v50  ;;  %v4922_v50 = vld [vmem:[%s5535_s3] ss:$0 sm:$0xff] }
 0x1f4   : > { %3570 = vmatmul.msk.f32.gmra.mxu3 %vm377_vm0, %v3536_v59  ;;  %3509 = vmatmul.msk.f32.gmra.mxu2 %vm377_vm0, %v4508_v46  ;;  %v2734_v39 = vmul.f32 %v4908_v51, %v2698_v42  ;;  %v1871_v53 = vadd.f32 %v4827_v56, %v1595_v15  ;;  %v2926_v42 = vld [vmem:[%s5536_s4 + $0xe8] sm:$0xff] }
 0x1f5   : > { %2984 = vmatpush.msrb.mxu2 %v2926_v42  ;;  %v3538_v42 = vld [vmem:[%s3880_s13 + $0x191] sm:$0xff] }
 0x1f6   : > { %v2148_v56 = vadd.f32 %v4821_v0, %v1871_v53 }
 0x1f7   : > { %v2329_v17 = vpop.f32.mrf.mxu3  ;;  %v4914_v5 = vpop.f32.mrf.mxu2 }
 0x1f8   : > { %v2423_v59 = vadd.f32 %v2329_v17, %v2147_v52  ;;  %v4924_v10 = vpop.f32.mrf.mxu1  ;;  %v2605_v46 = vpop.f32.mrf.mxu0  ;;  %v2770_v52 = vadd.f32 %v4922_v50, %v2734_v39 }
 0x1fa   : > { %v2699_v3 = vadd.f32 %v2605_v46, %v2423_v59  ;;  %v5662_v59 = vld [vmem:[#allocation40_spill] sm:$0xff]  ;;  %v2802_v39 = vmax.f32 %v2770_v52, 0.0 }
 0x1fb   : > { %3443 = vmatmul.msk.f32.gmra.mxu1 %vm377_vm0, %v4927_v35  ;;  %3636 = vmatmul.msk.f32.gmra.mxu0 %vm377_vm0, %v3602_v61  ;;  %v1596_v46 = vadd.f32 %v5662_v59, %v4458_v54  ;;  %v2942_v54 = vld [vmem:[%s5536_s4 + $0x168] sm:$0xff] }
 0x1fc   : > { %v2735_v17 = vmul.f32 %v4908_v51, %v2699_v3  ;;  %3571 = vmatmul.msk.f32.gmra.mxu3 %vm377_vm0, %v3537_v25  ;;  %3510 = vmatmul.msk.f32.gmra.mxu2 %vm377_vm0, %v3476_v31  ;;  %v4952_v25 = vld [vmem:[%s3880_s13 + $0x1c2] sm:$0xff] }
 0x1fd   : > { %v3603_v31 = vld [vmem:[%s3880_s13 + $0x182] sm:$0xff]  ;;  %v1872_v0 = vadd.f32 %v4848_v8, %v1596_v46  ;;  %3004 = vmatpush.msrb.mxu3 %v2942_v54 }
 0x1fe   : > { %v2771_v55 = vadd.f32 %v4922_v50, %v2735_v17 }
 0x1ff   : > { %v2332_v26 = vpop.f32.mrf.mxu3  ;;  %v4945_v15 = vpop.f32.mrf.mxu2 }
 0x200   : > { %v2803_v61 = vmax.f32 %v2771_v55, 0.0  ;;  %v2424_v19 = vadd.f32 %v2332_v26, %v2148_v56  ;;  %v4949_v3 = vpop.f32.mrf.mxu1  ;;  %v2608_v48 = vpop.f32.mrf.mxu0  ;;  %v5663_v55 = vld [vmem:[#allocation41_spill] sm:$0xff]  ;;  %v5664_v26 = vld [vmem:[#allocation42_spill] sm:$0xff] }
 0x201   : > { %v1597_v59 = vadd.f32 %v5664_v26, %v5663_v55  ;;  %v5666_v55 = vld [vmem:[#allocation44_spill] sm:$0xff] }
 0x202   : > { %v2834_v53 = vadd.f32 %v2803_v61, %v2802_v39  ;;  %v2700_v17 = vadd.f32 %v2608_v48, %v2424_v19  ;;  %v2149_v48 = vadd.f32 %v4842_v37, %v1872_v0  ;;  %v2925_v0 = vld [vmem:[%s5536_s4 + $0xe0] sm:$0xff] }
 0x203   : > { %3444 = vmatmul.msk.f32.gmra.mxu1 %vm377_vm0, %v4952_v25  ;;  %3637 = vmatmul.msk.f32.gmra.mxu0 %vm377_vm0, %v3603_v31  ;;  %v1873_v44 = vadd.f32 %v4873_v29, %v1597_v59 }
 0x204   : > { %v2736_v52 = vmul.f32 %v4908_v51, %v2700_v17  ;;  %3572 = vmatmul.msk.f32.gmra.mxu3 %vm377_vm0, %v3538_v42  ;;  %3511 = vmatmul.msk.f32.gmra.mxu2 %vm377_vm0, %v4489_v21  ;;  %v3411_v42 = vld [vmem:[%s3880_s13 + $0x1f2] sm:$0xff]  ;;  %v3539_v21 = vld [vmem:[%s3880_s13 + $0x1a1] sm:$0xff] }
 0x205   : > { %v3604_v17 = vld [vmem:[%s3880_s13 + $0x192] sm:$0xff]  ;;  %2985 = vmatpush.msrb.mxu2 %v2925_v0  ;;  %v2150_v29 = vadd.f32 %v4865_v20, %v1873_v44 }
 0x206   : > { %v2772_v19 = vadd.f32 %v4922_v50, %v2736_v52 }
 0x207   : > { %v2335_v8 = vpop.f32.mrf.mxu3  ;;  %v4972_v56 = vpop.f32.mrf.mxu2 }
 0x208   : > { %v2804_v46 = vmax.f32 %v2772_v19, 0.0  ;;  %v2425_v39 = vadd.f32 %v2335_v8, %v2149_v48  ;;  %v4976_v61 = vpop.f32.mrf.mxu1  ;;  %v2611_v31 = vpop.f32.mrf.mxu0  ;;  %v5665_v8 = vld [vmem:[#allocation43_spill] sm:$0xff] }
 0x209   : > { %v1598_v26 = vadd.f32 %v5666_v55, %v5665_v8  ;;  %v5667_v8 = vld [vmem:[#allocation45_spill] sm:$0xff] }
 0x20a   : > { %v2835_v54 = vadd.f32 %v2834_v53, %v2804_v46  ;;  %v2701_v37 = vadd.f32 %v2611_v31, %v2425_v39 }
 0x20b   : > { %3445 = vmatmul.msk.f32.gmra.mxu1 %vm377_vm0, %v3411_v42  ;;  %3638 = vmatmul.msk.f32.gmra.mxu0 %vm377_vm0, %v3604_v17  ;;  %v5000_v42 = vld [vmem:[%s3880_s13 + $0x202] sm:$0xff] }
 0x20c   : > { %v2737_v52 = vmul.f32 %v4908_v51, %v2701_v37  ;;  %3573 = vmatmul.msk.f32.gmra.mxu3 %vm377_vm0, %v3539_v21  ;;  %3512 = vmatmul.msk.f32.gmra.mxu2 %vm377_vm0, %v4505_v23  ;;  %v3605_v17 = vld [vmem:[%s3880_s13 + $0x1a2] sm:$0xff]  ;;  %v3540_v23 = vld [vmem:[%s3880_s13 + $0x1b1] sm:$0xff]  ;;  %v1874_v21 = vadd.f32 %v4891_v34, %v1598_v26 }
 0x20d   : > { %v2909_v37 = vld [vmem:[%s5536_s4 + $0x60] sm:$0xff]  ;;  %v2908_v34 = vld [vmem:[%s5536_s4 + $0x58] sm:$0xff] }
 0x20e   : > { %v2773_v53 = vadd.f32 %v4922_v50, %v2737_v52  ;;  %2965 = vmatpush.msrb.mxu1 %v2909_v37 }
 0x20f   : > { %v2338_v48 = vpop.f32.mrf.mxu3  ;;  %v4993_v19 = vpop.f32.mrf.mxu2 }
 0x210   : > { %v2805_v59 = vmax.f32 %v2773_v53, 0.0  ;;  %v2426_v46 = vadd.f32 %v2338_v48, %v2150_v29  ;;  %v4997_v39 = vpop.f32.mrf.mxu1  ;;  %v2614_v31 = vpop.f32.mrf.mxu0  ;;  %v2907_v29 = vld [vmem:[%s5536_s4 + $0x50] sm:$0xff]  ;;  %2966 = vmatpush.msrb.mxu1 %v2908_v34 }
 0x212   : > { %v2836_v20 = vadd.f32 %v2835_v54, %v2805_v59  ;;  %v2702_v44 = vadd.f32 %v2614_v31, %v2426_v46  ;;  %v2151_v54 = vadd.f32 %v4887_v40, %v1874_v21  ;;  %v3541_v40 = vld [vmem:[%s3880_s13 + $0x1c1] sm:$0xff]  ;;  %2967 = vmatpush.msrb.mxu1 %v2907_v29 }
 0x213   : > { %3446 = vmatmul.msk.f32.gmra.mxu1 %vm377_vm0, %v5000_v42  ;;  %3639 = vmatmul.msk.f32.gmra.mxu0 %vm377_vm0, %v3605_v17  ;;  %v5030_v17 = vld [vmem:[%s3880_s13 + $0x212] sm:$0xff] }
 0x214   : > { %v2738_v0 = vmul.f32 %v4908_v51, %v2702_v44  ;;  %3574 = vmatmul.msk.f32.gmra.mxu3 %vm377_vm0, %v3540_v23  ;;  %3513 = vmatmul.msk.f32.gmra.mxu2 %vm377_vm0, %v4523_v7  ;;  %v5668_v7 = vld [vmem:[#allocation46_spill] sm:$0xff] }
 0x215   : > { %v1599_v55 = vadd.f32 %v5668_v7, %v5667_v8  ;;  %v3480_v23 = vld [vmem:[%s3880_s13 + $0x230] sm:$0xff]  ;;  %v2904_v8 = vld [vmem:[%s5536_s4 + $0x38] sm:$0xff] }
 0x216   : > { %v2774_v52 = vadd.f32 %v4922_v50, %v2738_v0  ;;  %v2906_v0 = vld [vmem:[%s5536_s4 + $0x48] sm:$0xff]  ;;  %v5669_v7 = vld [vmem:[#allocation47_spill] sm:$0xff] }
 0x217   : > { %v2341_v53 = vpop.f32.mrf.mxu3  ;;  %v5023_v48 = vpop.f32.mrf.mxu2  ;;  %v1875_v21 = vadd.f32 %v4924_v10, %v1599_v55  ;;  %v2941_v10 = vld [vmem:[%s5536_s4 + $0x160] sm:$0xff]  ;;  %2968 = vmatpush.msrb.mxu1 %v2906_v0 }
 0x218   : > { %v2806_v26 = vmax.f32 %v2774_v52, 0.0  ;;  %v2427_v59 = vadd.f32 %v2341_v53, %v2151_v54  ;;  %v5027_v46 = vpop.f32.mrf.mxu1  ;;  %v2617_v31 = vpop.f32.mrf.mxu0  ;;  %3005 = vmatpush.msrb.mxu3 %v2941_v10  ;;  %v5670_v55 = vld [vmem:[#allocation48_spill] sm:$0xff] }
 0x219   : > { %v2152_v54 = vadd.f32 %v4914_v5, %v1875_v21  ;;  %v3542_v5 = vld [vmem:[%s3880_s13 + $0x1d1] sm:$0xff]  ;;  %v3481_v21 = vld [vmem:[%s3880_s13 + $0x240] sm:$0xff] }
 0x21a   : > { %v2837_v44 = vadd.f32 %v2836_v20, %v2806_v26  ;;  %v2703_v37 = vadd.f32 %v2617_v31, %v2427_v59  ;;  %v2924_v20 = vld [vmem:[%s5536_s4 + $0xd8] sm:$0xff]  ;;  %v1600_v26 = vadd.f32 %v5670_v55, %v5669_v7  ;;  %v5671_v7 = vld [vmem:[#allocation49_spill] sm:$0xff]  ;;  %v5672_v55 = vld [vmem:[#allocation50_spill] sm:$0xff] }
 0x21b   : > { %3447 = vmatmul.msk.f32.gmra.mxu1 %vm377_vm0, %v5030_v17  ;;  %3640 = vmatmul.msk.f32.gmra.mxu0 %vm377_vm0, %v4927_v35  ;;  %v2905_v35 = vld [vmem:[%s5536_s4 + $0x40] sm:$0xff] }
 0x21c   : > { %v2739_v34 = vmul.f32 %v4908_v51, %v2703_v37  ;;  %3575 = vmatmul.msk.f32.gmra.mxu3 %vm377_vm0, %v3541_v40  ;;  %3514 = vmatmul.msk.f32.gmra.mxu2 %vm377_vm0, %v3480_v23  ;;  %v5066_v37 = vld [vmem:[%s3880_s13 + $0x222] sm:$0xff]  ;;  %v1876_v0 = vadd.f32 %v4949_v3, %v1600_v26  ;;  %v1601_v26 = vadd.f32 %v5672_v55, %v5671_v7 }
 0x21d   : > { %2986 = vmatpush.msrb.mxu2 %v2924_v20  ;;  %2969 = vmatpush.msrb.mxu1 %v2905_v35  ;;  %v2940_v20 = vld [vmem:[%s5536_s4 + $0x158] sm:$0xff]  ;;  %v2902_v3 = vld [vmem:[%s5536_s4 + $0x28] sm:$0xff] }
 0x21e   : > { %v2775_v52 = vadd.f32 %v4922_v50, %v2739_v34  ;;  %3006 = vmatpush.msrb.mxu3 %v2940_v20  ;;  %v1877_v20 = vadd.f32 %v4976_v61, %v1601_v26  ;;  %v2899_v61 = vld [vmem:[%s5536_s4 + $0x10] sm:$0xff]  ;;  %v2898_v7 = vld [vmem:[%s5536_s4 + $0x8] sm:$0xff] }
 0x21f   : > { %v2344_v29 = vpop.f32.mrf.mxu3  ;;  %v5056_v53 = vpop.f32.mrf.mxu2  ;;  %2970 = vmatpush.msrb.mxu1 %v2904_v8 }
 0x220   : > { %v2807_v59 = vmax.f32 %v2775_v52, 0.0  ;;  %v2428_v31 = vadd.f32 %v2344_v29, %v2152_v54  ;;  %v5063_v40 = vpop.f32.mrf.mxu1  ;;  %v2620_v23 = vpop.f32.mrf.mxu0  ;;  %v2903_v54 = vld [vmem:[%s5536_s4 + $0x30] sm:$0xff]  ;;  %v2901_v52 = vld [vmem:[%s5536_s4 + $0x20] sm:$0xff] }
 0x221   : > { %2971 = vmatpush.msrb.mxu1 %v2903_v54 }
 0x222   : > { %v2838_v34 = vadd.f32 %v2837_v44, %v2807_v59  ;;  %v2704_v10 = vadd.f32 %v2620_v23, %v2428_v31  ;;  %v2153_v44 = vadd.f32 %v4945_v15, %v1876_v0  ;;  %v3608_v15 = vld [vmem:[%s3880_s13 + $0x1d2] sm:$0xff]  ;;  %v3543_v0 = vld [vmem:[%s3880_s13 + $0x201] sm:$0xff] }
 0x223   : > { %3448 = vmatmul.msk.f32.gmra.mxu1 %vm377_vm0, %v5066_v37  ;;  %3641 = vmatmul.msk.f32.gmra.mxu0 %vm377_vm0, %v4952_v25 }
 0x224   : > { %v2740_v35 = vmul.f32 %v4908_v51, %v2704_v10  ;;  %3576 = vmatmul.msk.f32.gmra.mxu3 %vm377_vm0, %v3542_v5  ;;  %3515 = vmatmul.msk.f32.gmra.mxu2 %vm377_vm0, %v3481_v21  ;;  %v5099_v21 = vld [vmem:[%s3880_s13 + $0x232] sm:$0xff] }
 0x225   : > { %2972 = vmatpush.msrb.mxu1 %v2902_v3  ;;  %v3482_v10 = vld [vmem:[%s3880_s13 + $0x250] sm:$0xff]  ;;  %v2900_v3 = vld [vmem:[%s5536_s4 + $0x18] sm:$0xff] }
 0x226   : > { %v2776_v25 = vadd.f32 %v4922_v50, %v2740_v35 }
 0x227   : > { %v2347_v29 = vpop.f32.mrf.mxu3  ;;  %v5092_v8 = vpop.f32.mrf.mxu2  ;;  %2973 = vmatpush.msrb.mxu1 %v2901_v52  ;;  %v2154_v52 = vadd.f32 %v4972_v56, %v1877_v20  ;;  %v3544_v56 = vld [vmem:[%s3880_s13 + $0x211] sm:$0xff] }
 0x228   : > { %v2808_v59 = vmax.f32 %v2776_v25, 0.0  ;;  %v2429_v31 = vadd.f32 %v2347_v29, %v2153_v44  ;;  %v5096_v23 = vpop.f32.mrf.mxu1  ;;  %v2623_v5 = vpop.f32.mrf.mxu0  ;;  %v2923_v44 = vld [vmem:[%s5536_s4 + $0xd0] sm:$0xff] }
 0x229   : > { %2974 = vmatpush.msrb.mxu1 %v2900_v3  ;;  %2987 = vmatpush.msrb.mxu2 %v2923_v44  ;;  %v5132_v3 = vld [vmem:[%s3880_s13 + $0x242] sm:$0xff] }
 0x22a   : > { %v2839_v54 = vadd.f32 %v2838_v34, %v2808_v59  ;;  %v2705_v35 = vadd.f32 %v2623_v5, %v2429_v31  ;;  %v3770_v34 = vmov 64.0   ;;  %v5673_v59 = vld [vmem:[#allocation51_spill] sm:$0xff]  ;;  %v5674_v31 = vld [vmem:[#allocation52_spill] sm:$0xff] }
 0x22b   : > { %3449 = vmatmul.msk.f32.gmra.mxu1 %vm377_vm0, %v5099_v21  ;;  %3642 = vmatmul.msk.f32.gmra.mxu0 %vm377_vm0, %v3608_v15  ;;  %3702 = vrcp.f32 %v3770_v34  ;;  %v1602_v5 = vadd.f32 %v5674_v31, %v5673_v59  ;;  %v5675_v59 = vld [vmem:[#allocation53_spill] sm:$0xff] }
 0x22c   : > { %v2741_v25 = vmul.f32 %v4908_v51, %v2705_v35  ;;  %3577 = vmatmul.msk.f32.gmra.mxu3 %vm377_vm0, %v3543_v0  ;;  %3516 = vmatmul.msk.f32.gmra.mxu2 %vm377_vm0, %v3482_v10 }
 0x22d   : > { %2975 = vmatpush.msrb.mxu1 %v2899_v61  ;;  %v1878_v20 = vadd.f32 %v4997_v39, %v1602_v5  ;;  %v2897_v61 = vld [vmem:[%s5536_s4] sm:$0xff] }
 0x22e   : > { %v2777_v29 = vadd.f32 %v4922_v50, %v2741_v25  ;;  %v2939_v25 = vld [vmem:[%s5536_s4 + $0x150] sm:$0xff] }
 0x22f   : > { %v2350_v55 = vpop.f32.mrf.mxu3  ;;  %v5125_v26 = vpop.f32.mrf.mxu2  ;;  %2976 = vmatpush.msrb.mxu1 %v2898_v7  ;;  %3007 = vmatpush.msrb.mxu3 %v2939_v25 }
 0x230   : > { %v2809_v15 = vmax.f32 %v2777_v29, 0.0  ;;  %v2430_v0 = vadd.f32 %v2350_v55, %v2154_v52  ;;  %v5129_v10 = vpop.f32.mrf.mxu1  ;;  %v2626_v35 = vpop.f32.mrf.mxu0 }
 0x231   : > { %v5142_v34 = vpop.eup %3702  ;;  %2977 = vmatpush.msrb.mxu1 %v2897_v61  ;;  %v3545_v61 = vld [vmem:[%s3880_s13 + $0x221] sm:$0xff] }
 0x232   : > { %v2840_v44 = vadd.f32 %v2839_v54, %v2809_v15  ;;  %v2706_v39 = vadd.f32 %v2626_v35, %v2430_v0  ;;  %v2155_v54 = vadd.f32 %v4993_v19, %v1878_v20  ;;  %v2887_v7 = vmul.f32 64.0, %v5142_v34  ;;  %v3484_v19 = vld [vmem:[%s3880_s13 + $0x270] sm:$0xff] }
 0x233   : > { %3450 = vmatmul.msk.f32.gmra.mxu1 %vm377_vm0, %v5132_v3  ;;  %3643 = vmatmul.msk.f32.gmra.mxu0 %vm377_vm0, %v5000_v42  ;;  %v5676_v42 = vld [vmem:[#allocation54_spill] sm:$0xff]  ;;  %vm2891_vm1 = vweird.f32 %v5142_v34 }
 0x234   : > { %v2841_v52 = vrot.slane %v2840_v44, 4  ;;  %3578 = vmatmul.msk.f32.gmra.mxu3 %vm377_vm0, %v3544_v56  ;;  %3517 = vmatmul.msk.f32.gmra.mxu2 %vm377_vm0, %v4610_v30  ;;  %v1603_v31 = vadd.f32 %v5676_v42, %v5675_v59  ;;  %v2742_v5 = vmul.f32 %v4908_v51, %v2706_v39  ;;  %v5159_v56 = vld [vmem:[%s3880_s13 + $0x252] sm:$0xff]  ;;  %v2922_v59 = vld [vmem:[%s5536_s4 + $0xc8] sm:$0xff] }
 0x235   : > { %2988 = vmatpush.msrb.mxu2 %v2922_v59 }
 0x236   : > { %v2842_v29 = vadd.f32 %v2841_v52, %v2840_v44  ;;  %v1879_v20 = vadd.f32 %v5027_v46, %v1603_v31  ;;  %v2888_v52 = vsub.f32 1.0, %v2887_v7  ;;  %v2778_v39 = vadd.f32 %v4922_v50, %v2742_v5 }
 0x237   : > { %v2353_v55 = vpop.f32.mrf.mxu3  ;;  %v5161_v25 = vpop.f32.mrf.mxu2 }
 0x238   : > { %v2431_v15 = vadd.f32 %v2353_v55, %v2155_v54  ;;  %v5156_v0 = vpop.f32.mrf.mxu1  ;;  %v2629_v35 = vpop.f32.mrf.mxu0  ;;  %v2843_v30 = vrot.slane %v2842_v29, 2  ;;  %v2156_v7 = vadd.f32 %v5023_v48, %v1879_v20  ;;  %v2889_v42 = vmul.f32 %v5142_v34, %v2888_v52 }
 0x239   : > { %v2810_v5 = vmax.f32 %v2778_v39, 0.0 }
 0x23a   : > { %v2707_v44 = vadd.f32 %v2629_v35, %v2431_v15  ;;  %v2844_v46 = vadd.f32 %v2843_v30, %v2842_v29  ;;  %v3546_v30 = vld [vmem:[%s3880_s13 + $0x231] sm:$0xff]  ;;  %v2890_v52 = vadd.f32 %v5142_v34, %v2889_v42  ;;  %v1605_v42 = vadd.f32 %v4583_v28, %v4581_v2 }
 0x23b   : > { %3451 = vmatmul.msk.f32.gmra.mxu1 %vm377_vm0, %v5159_v56  ;;  %3644 = vmatmul.msk.f32.gmra.mxu0 %vm377_vm0, %v5030_v17  ;;  %v1604_v17 = vadd.f32 %v4571_v27, %v4569_v24  ;;  %v2938_v27 = vld [vmem:[%s5536_s4 + $0x148] sm:$0xff] }
 0x23c   : > { %v2743_v54 = vmul.f32 %v4908_v51, %v2707_v44  ;;  %3579 = vmatmul.msk.f32.gmra.mxu3 %vm377_vm0, %v3545_v61  ;;  %3518 = vmatmul.msk.f32.gmra.mxu2 %vm377_vm0, %v3484_v19  ;;  %v2845_v29 = vrot.slane %v2844_v46, 1 }
 0x23d   : > { %v1880_v48 = vadd.f32 %v5063_v40, %v1604_v17  ;;  %3008 = vmatpush.msrb.mxu3 %v2938_v27 }
 0x23e   : > { %v2779_v55 = vadd.f32 %v4922_v50, %v2743_v54  ;;  %v2846_v59 = vadd.f32 %v2845_v29, %v2844_v46 }
 0x23f   : > { %v2356_v31 = vpop.f32.mrf.mxu3  ;;  %v5193_v24 = vpop.f32.mrf.mxu2  ;;  %v2157_v39 = vadd.f32 %v5056_v53, %v1880_v48  ;;  %v1606_v48 = vadd.f32 %v4595_v36, %v4593_v22  ;;  %v2919_v36 = vld [vmem:[%s5536_s4 + $0xb0] sm:$0xff] }
 0x240   : > { %v2811_v15 = vmax.f32 %v2779_v55, 0.0  ;;  %v2432_v35 = vadd.f32 %v2356_v31, %v2156_v7  ;;  %v5182_v44 = vpop.f32.mrf.mxu1  ;;  %v2632_v61 = vpop.f32.mrf.mxu0  ;;  %v5205_v7 = vsel %vm2891_vm1, %v5142_v34, %v2890_v52  ;;  %v2921_v34 = vld [vmem:[%s5536_s4 + $0xc0] sm:$0xff] }
 0x241   : > { %v2893_v46 = vmul.f32 %v5205_v7, %v2846_v59  ;;  %2989 = vmatpush.msrb.mxu2 %v2921_v34  ;;  %v1882_v27 = vadd.f32 %v5129_v10, %v1606_v48  ;;  %v2916_v34 = vld [vmem:[%s5536_s4 + $0x98] sm:$0xff]  ;;  %v1608_v48 = vadd.f32 %v4623_v1, %v4621_v45 }
 0x242   : > { %v2847_v19 = vadd.f32 %v2811_v15, %v2810_v5  ;;  %v2708_v20 = vadd.f32 %v2632_v61, %v2432_v35  ;;  %v3547_v15 = vld [vmem:[%s3880_s13 + $0x241] sm:$0xff]  ;;  %v1881_v35 = vadd.f32 %v5096_v23, %v1605_v42 }
 0x243   : > { %3452 = vmatmul.msk.f32.gmra.mxu1 %vm377_vm0, %v5185_v11  ;;  %3645 = vmatmul.msk.f32.gmra.mxu0 %vm377_vm0, %v5066_v37 }
 0x244   : > { %v2744_v40 = vmul.f32 %v4908_v51, %v2708_v20  ;;  %3580 = vmatmul.msk.f32.gmra.mxu3 %vm377_vm0, %v3546_v30  ;;  %v2158_v23 = vadd.f32 %v5092_v8, %v1881_v35  ;;  %v2159_v8 = vadd.f32 %v5125_v26, %v1882_v27  ;;  %v2917_v26 = vld [vmem:[%s5536_s4 + $0xa0] sm:$0xff]  ;;  %v3550_v27 = vld [vmem:[%s3880_s13 + $0x271] sm:$0xff] }
 0x246   : > { %v2780_v54 = vadd.f32 %v4922_v50, %v2744_v40 }
 0x247   : > { %v2359_v55 = vpop.f32.mrf.mxu3  ;;  %v5221_v28 = vpop.f32.mrf.mxu2 }
 0x248   : > { %v2812_v37 = vmax.f32 %v2780_v54, 0.0  ;;  %v2433_v31 = vadd.f32 %v2359_v55, %v2157_v39  ;;  %v2635_v17 = vpop.f32.mrf.mxu0  ;;  %v5209_v5 = vpop.f32.mrf.mxu1  ;;  %v2920_v39 = vld [vmem:[%s5536_s4 + $0xb8] sm:$0xff]  ;;  %v2918_v55 = vld [vmem:[%s5536_s4 + $0xa8] sm:$0xff] }
 0x249   : > { %2990 = vmatpush.msrb.mxu2 %v2920_v39 }
 0x24a   : > { %v2848_v53 = vadd.f32 %v2847_v19, %v2812_v37  ;;  %v2709_v61 = vadd.f32 %v2635_v17, %v2433_v31  ;;  %v1607_v37 = vadd.f32 %v4607_v41, %v4605_v12  ;;  %v2915_v41 = vld [vmem:[%s5536_s4 + $0x90] sm:$0xff] }
 0x24b   : > { %3646 = vmatmul.msk.f32.gmra.mxu0 %vm377_vm0, %v5099_v21  ;;  %2978 = vmatmul.f32.vlgmr.msrb.gmra.mxu1 %v2893_v46  ;;  %v3548_v21 = vld [vmem:[%s3880_s13 + $0x251] sm:$0xff]  ;;  %v3549_v46 = vld [vmem:[%s3880_s13 + $0x261] sm:$0xff] }
 0x24c   : > { %v2745_v2 = vmul.f32 %v4908_v51, %v2709_v61  ;;  %3581 = vmatmul.msk.f32.gmra.mxu3 %vm377_vm0, %v3547_v15  ;;  %2991 = vmatpush.msrb.mxu2 %v2919_v36  ;;  %v1883_v35 = vadd.f32 %v5156_v0, %v1607_v37 }
 0x24e   : > { %v2781_v29 = vadd.f32 %v4922_v50, %v2745_v2  ;;  %2992 = vmatpush.msrb.mxu2 %v2918_v55  ;;  %v2160_v2 = vadd.f32 %v5161_v25, %v1883_v35  ;;  %v2913_v25 = vld [vmem:[%s5536_s4 + $0x80] sm:$0xff] }
 0x24f   : > { %v2362_v30 = vpop.f32.mrf.mxu3 }
 0x250   : > { %v2813_v19 = vmax.f32 %v2781_v29, 0.0  ;;  %v2434_v20 = vadd.f32 %v2362_v30, %v2158_v23  ;;  %v2638_v52 = vpop.f32.mrf.mxu0  ;;  %v5232_v54 = vpop.f32.mrf.mxu1  ;;  %2993 = vmatpush.msrb.mxu2 %v2917_v26  ;;  %v2914_v29 = vld [vmem:[%s5536_s4 + $0x88] sm:$0xff] }
 0x252   : > { %v2849_v40 = vadd.f32 %v2848_v53, %v2813_v19  ;;  %v2710_v59 = vadd.f32 %v2638_v52, %v2434_v20  ;;  %2994 = vmatpush.msrb.mxu2 %v2916_v34 }
 0x253   : > { %3647 = vmatmul.msk.f32.gmra.mxu0 %vm377_vm0, %v5132_v3  ;;  %v5246_v3 = vpop.f32.mrf.mxu2 }
 0x254   : > { %v2746_v22 = vmul.f32 %v4908_v51, %v2710_v59  ;;  %3582 = vmatmul.msk.f32.gmra.mxu3 %vm377_vm0, %v3548_v21  ;;  %2995 = vmatpush.msrb.mxu2 %v2915_v41 }
 0x256   : > { %v2782_v10 = vadd.f32 %v4922_v50, %v2746_v22  ;;  %2996 = vmatpush.msrb.mxu2 %v2914_v29  ;;  %v2936_v22 = vld [vmem:[%s5536_s4 + $0x138] sm:$0xff] }
 0x257   : > { %v2365_v42 = vpop.f32.mrf.mxu3 }
 0x258   : > { %v2814_v31 = vmax.f32 %v2782_v10, 0.0  ;;  %v2435_v17 = vadd.f32 %v2365_v42, %v2159_v8  ;;  %v2641_v15 = vpop.f32.mrf.mxu0  ;;  %v5265_v0 = vpop.f32.mrf.mxu1  ;;  %2997 = vmatpush.msrb.mxu2 %v2913_v25  ;;  %v1609_v10 = vadd.f32 %v4636_v38, %v4634_v16  ;;  %v1610_v16 = vadd.f32 %v4649_v14, %v4647_v43 }
 0x259   : > { %v1611_v43 = vadd.f32 %v4662_v63, %v4660_v57  ;;  %v1612_v57 = vadd.f32 %v4675_v9, %v4673_v32 }
 0x25a   : > { %v2850_v53 = vadd.f32 %v2849_v40, %v2814_v31  ;;  %v2711_v61 = vadd.f32 %v2641_v15, %v2435_v17  ;;  %v1884_v40 = vadd.f32 %v5182_v44, %v1608_v48  ;;  %v3616_v31 = vld [vmem:[%s3880_s13 + $0x272] sm:$0xff]  ;;  %s3092_s13 = sshll.u32 %s300_s22, 4  ;;  %s3093_s13 = int_to_ptr.vmem [resolvable:$true] %s3092_s13 }
 0x25b   : > { %3648 = vmatmul.msk.f32.gmra.mxu0 %vm377_vm0, %v5159_v56  ;;  %v2937_v56 = vld [vmem:[%s5536_s4 + $0x140] sm:$0xff]  ;;  %v2104_v21 = vpop.f32.mrf.mxu2 }
 0x25c   : > { %v2747_v12 = vmul.f32 %v4908_v51, %v2711_v61  ;;  %3583 = vmatmul.msk.f32.gmra.mxu3 %vm377_vm0, %v3549_v46  ;;  %v2161_v1 = vadd.f32 %v5193_v24, %v1884_v40 }
 0x25d   : > { %3009 = vmatpush.msrb.mxu3 %v2937_v56 }
 0x25e   : > { %v2783_v23 = vadd.f32 %v4922_v50, %v2747_v12 }
 0x25f   : > { %v2368_v30 = vpop.f32.mrf.mxu3  ;;  %3010 = vmatpush.msrb.mxu3 %v2936_v22 }
 0x260   : > { %v2815_v19 = vmax.f32 %v2783_v23, 0.0  ;;  %v2436_v20 = vadd.f32 %v2368_v30, %v2160_v2  ;;  %v2644_v52 = vpop.f32.mrf.mxu0  ;;  %v1830_v44 = vpop.f32.mrf.mxu1  ;;  %v2935_v2 = vld [vmem:[%s5536_s4 + $0x130] sm:$0xff] }
 0x261   : > { %3011 = vmatpush.msrb.mxu3 %v2935_v2 }
 0x262   : > { %v2851_v59 = vadd.f32 %v2850_v53, %v2815_v19  ;;  %v2712_v39 = vadd.f32 %v2644_v52, %v2436_v20  ;;  %v1887_v52 = vadd.f32 %v5265_v0, %v1611_v43 }
 0x263   : > { %3649 = vmatmul.msk.f32.gmra.mxu0 %vm377_vm0, %v5185_v11  ;;  %v1885_v11 = vadd.f32 %v5209_v5, %v1609_v10  ;;  %v2107_v26 = vpop.f32.mrf.mxu2  ;;  %v1886_v5 = vadd.f32 %v5232_v54, %v1610_v16 }
 0x264   : > { %v2748_v45 = vmul.f32 %v4908_v51, %v2712_v39  ;;  %3584 = vmatmul.msk.f32.gmra.mxu3 %vm377_vm0, %v3550_v27  ;;  %v2164_v22 = vadd.f32 %v2104_v21, %v1887_v52  ;;  %v2934_v21 = vld [vmem:[%s5536_s4 + $0x128] sm:$0xff] }
 0x265   : > { %v2162_v46 = vadd.f32 %v5221_v28, %v1885_v11  ;;  %v2163_v29 = vadd.f32 %v5246_v3, %v1886_v5  ;;  %3012 = vmatpush.msrb.mxu3 %v2934_v21 }
 0x266   : > { %v2784_v36 = vadd.f32 %v4922_v50, %v2748_v45 }
 0x267   : > { %v2371_v8 = vpop.f32.mrf.mxu3 }
 0x268   : > { %v2816_v55 = vmax.f32 %v2784_v36, 0.0  ;;  %v2437_v42 = vadd.f32 %v2371_v8, %v2161_v1  ;;  %v2647_v37 = vpop.f32.mrf.mxu0  ;;  %v1833_v12 = vpop.f32.mrf.mxu1 }
 0x26a   : > { %v2852_v17 = vadd.f32 %v2851_v59, %v2816_v55  ;;  %v2713_v15 = vadd.f32 %v2647_v37, %v2437_v42  ;;  %v1888_v37 = vadd.f32 %v1830_v44, %v1612_v57  ;;  %v2930_v57 = vld [vmem:[%s5536_s4 + $0x108] sm:$0xff] }
 0x26b   : > { %3650 = vmatmul.msk.f32.gmra.mxu0 %vm377_vm0, %v3616_v31  ;;  %v2110_v56 = vpop.f32.mrf.mxu2 }
 0x26c   : > { %v2749_v24 = vmul.f32 %v4908_v51, %v2713_v15  ;;  %v2165_v9 = vadd.f32 %v2107_v26, %v1888_v37 }
 0x26e   : > { %v2785_v35 = vadd.f32 %v4922_v50, %v2749_v24 }
 0x26f   : > { %v2374_v53 = vpop.f32.mrf.mxu3 }
 0x270   : > { %v2817_v38 = vmax.f32 %v2785_v35, 0.0  ;;  %v2438_v61 = vadd.f32 %v2374_v53, %v2162_v46  ;;  %v2650_v34 = vpop.f32.mrf.mxu0  ;;  %v1836_v40 = vpop.f32.mrf.mxu1  ;;  %v1613_v46 = vadd.f32 %v4688_v6, %v4686_v13 }
 0x272   : > { %v2853_v41 = vadd.f32 %v2852_v17, %v2817_v38  ;;  %v2714_v28 = vadd.f32 %v2650_v34, %v2438_v61  ;;  %v1889_v38 = vadd.f32 %v1833_v12, %v1613_v46 }
 0x273   : > { %v2113_v63 = vpop.f32.mrf.mxu2 }
 0x274   : > { %v2854_v23 = vrot.slane %v2853_v41, 4  ;;  %v2750_v19 = vmul.f32 %v4908_v51, %v2714_v28  ;;  %v1614_v28 = vadd.f32 %v4701_v60, %v4699_v18  ;;  %v2933_v18 = vld [vmem:[%s5536_s4 + $0x120] sm:$0xff] }
 0x275   : > { %3013 = vmatpush.msrb.mxu3 %v2933_v18 }
 0x276   : > { %v2855_v30 = vadd.f32 %v2854_v23, %v2853_v41  ;;  %v2786_v39 = vadd.f32 %v4922_v50, %v2750_v19  ;;  %v2166_v41 = vadd.f32 %v2110_v56, %v1889_v38  ;;  %v1890_v6 = vadd.f32 %v1836_v40, %v1614_v28 }
 0x277   : > { %v2377_v48 = vpop.f32.mrf.mxu3 }
 0x278   : > { %v2856_v14 = vrot.slane %v2855_v30, 2  ;;  %v2439_v54 = vadd.f32 %v2377_v48, %v2163_v29  ;;  %v2653_v20 = vpop.f32.mrf.mxu0  ;;  %v2818_v8 = vmax.f32 %v2786_v39, 0.0  ;;  %v1839_v32 = vpop.f32.mrf.mxu1  ;;  %v2167_v19 = vadd.f32 %v2113_v63, %v1890_v6 }
 0x27a   : > { %v2857_v25 = vadd.f32 %v2856_v14, %v2855_v30  ;;  %v2715_v27 = vadd.f32 %v2653_v20, %v2439_v54  ;;  %v1615_v20 = vadd.f32 %v4716_v4, %v4714_v62  ;;  %v2931_v62 = vld [vmem:[%s5536_s4 + $0x110] sm:$0xff] }
 0x27b   : > { %v2116_v16 = vpop.f32.mrf.mxu2 }
 0x27c   : > { %v2858_v59 = vrot.slane %v2857_v25, 1  ;;  %v2751_v3 = vmul.f32 %v4908_v51, %v2715_v27  ;;  %v1891_v40 = vadd.f32 %v1839_v32, %v1615_v20 }
 0x27e   : > { %v2859_v45 = vadd.f32 %v2858_v59, %v2857_v25  ;;  %v2787_v1 = vadd.f32 %v4922_v50, %v2751_v3  ;;  %v2932_v3 = vld [vmem:[%s5536_s4 + $0x118] sm:$0xff] }
 0x27f   : > { %v2380_v36 = vpop.f32.mrf.mxu3  ;;  %3014 = vmatpush.msrb.mxu3 %v2932_v3 }
 0x280   : > { %v2819_v10 = vmax.f32 %v2787_v1, 0.0  ;;  %v2440_v0 = vadd.f32 %v2380_v36, %v2164_v22  ;;  %v2656_v55 = vpop.f32.mrf.mxu0  ;;  %v2894_v42 = vmul.f32 %v5205_v7, %v2859_v45  ;;  %v1842_v23 = vpop.f32.mrf.mxu1  ;;  %v2168_v45 = vadd.f32 %v2116_v16, %v1891_v40 }
 0x281   : > { %3015 = vmatpush.msrb.mxu3 %v2931_v62  ;;  %v1616_v36 = vadd.f32 %v4730_v33, %v4728_v49  ;;  %v5677_v49 = vld [vmem:[#allocation8_spill] sm:$0xff] }
 0x282   : > { %v2860_v31 = vadd.f32 %v2819_v10, %v2818_v8  ;;  %v2716_v11 = vadd.f32 %v2656_v55, %v2440_v0  ;;  %2998 = vmatmul.f32.vlgmr.msrb.gmra.mxu2 %v2894_v42  ;;  %v2929_v55 = vld [vmem:[%s5536_s4 + $0x100] sm:$0xff]  ;;  %v1617_v33 = vadd.f32 %v5677_v49, %v4743_v58 }
 0x283   : > { %v2119_v14 = vpop.f32.mrf.mxu2  ;;  %3016 = vmatpush.msrb.mxu3 %v2930_v57  ;;  %v1892_v42 = vadd.f32 %v1842_v23, %v1616_v36  ;;  %v5679_v23 = vld [vmem:[#allocation5_spill] sm:$0xff]  ;;  %v5365_v62 = vld [vmem:[%s5534_s2] ss:$0 sm:$0xff]  ;;  %v5682_v57 = vld [vmem:[#allocation6_spill] sm:$0xff] }
 0x284   : > { %v2752_v17 = vmul.f32 %v4908_v51, %v2716_v11  ;;  %v5382_v49 = vld [vmem:[%s5535_s3] ss:$0 sm:$0xff] }
 0x285   : > { %3017 = vmatpush.msrb.mxu3 %v2929_v55 }
 0x286   : > { %v2788_v15 = vadd.f32 %v4922_v50, %v2752_v17  ;;  %v2169_v17 = vadd.f32 %v2119_v14, %v1892_v42 }
 0x287   : > { %v2383_v24 = vpop.f32.mrf.mxu3 }
 0x288   : > { %v2820_v35 = vmax.f32 %v2788_v15, 0.0  ;;  %v2441_v44 = vadd.f32 %v2383_v24, %v2165_v9  ;;  %v2659_v53 = vpop.f32.mrf.mxu0  ;;  %v1845_v60 = vpop.f32.mrf.mxu1 }
 0x28a   : > { %v2861_v61 = vadd.f32 %v2860_v31, %v2820_v35  ;;  %v2717_v34 = vadd.f32 %v2659_v53, %v2441_v44  ;;  %v1893_v44 = vadd.f32 %v1845_v60, %v1617_v33 }
 0x28b   : > { %v2122_v4 = vpop.f32.mrf.mxu2 }
 0x28c   : > { %v2753_v5 = vmul.f32 %v4908_v51, %v2717_v34  ;;  %v2170_v34 = vadd.f32 %v2122_v4, %v1893_v44  ;;  %v5684_v44 = vld [vmem:[#allocation15_spill] sm:$0xff] }
 0x28e   : > { %v2789_v2 = vadd.f32 %v4922_v50, %v2753_v5 }
 0x28f   : > { %v2386_v26 = vpop.f32.mrf.mxu3 }
 0x290   : > { %v2821_v29 = vmax.f32 %v2789_v2, 0.0  ;;  %v2442_v30 = vadd.f32 %v2386_v26, %v2166_v41  ;;  %v2662_v13 = vpop.f32.mrf.mxu0  ;;  %v1848_v11 = vpop.f32.mrf.mxu1  ;;  %v5678_v2 = vld [vmem:[#allocation21_spill] sm:$0xff] }
 0x291   : > { %v1618_v26 = vadd.f32 %v5679_v23, %v5678_v2  ;;  %v2956_v23 = vld [vmem:[%s5536_s4 + $0x1d8] sm:$0xff] }
 0x292   : > { %v2862_v48 = vadd.f32 %v2861_v61, %v2821_v29  ;;  %v2718_v43 = vadd.f32 %v2662_v13, %v2442_v30 }
 0x293   : > { %v2125_v9 = vpop.f32.mrf.mxu2  ;;  %v1894_v13 = vadd.f32 %v1848_v11, %v1618_v26 }
 0x294   : > { %v2754_v12 = vmul.f32 %v4908_v51, %v2718_v43 }
 0x295   : > { %v2171_v14 = vadd.f32 %v2125_v9, %v1894_v13  ;;  %v2954_v13 = vld [vmem:[%s5536_s4 + $0x1c8] sm:$0xff] }
 0x296   : > { %v2790_v54 = vadd.f32 %v4922_v50, %v2754_v12 }
 0x297   : > { %v2389_v56 = vpop.f32.mrf.mxu3 }
 0x298   : > { %v2822_v52 = vmax.f32 %v2790_v54, 0.0  ;;  %v2443_v25 = vadd.f32 %v2389_v56, %v2167_v19  ;;  %v2665_v27 = vpop.f32.mrf.mxu0  ;;  %v1851_v61 = vpop.f32.mrf.mxu1  ;;  %v5680_v56 = vld [vmem:[#allocation11_spill] sm:$0xff] }
 0x299   : > { %v1619_v20 = vadd.f32 %v5680_v56, %v4773_v47 }
 0x29a   : > { %v2863_v59 = vadd.f32 %v2862_v48, %v2822_v52  ;;  %v2719_v39 = vadd.f32 %v2665_v27, %v2443_v25 }
 0x29b   : > { %v2128_v58 = vpop.f32.mrf.mxu2  ;;  %v1895_v60 = vadd.f32 %v1851_v61, %v1619_v20  ;;  %v2953_v20 = vld [vmem:[%s5536_s4 + $0x1c0] sm:$0xff] }
 0x29c   : > { %v2755_v22 = vmul.f32 %v4908_v51, %v2719_v39 }
 0x29d   : > { %v2172_v47 = vadd.f32 %v2128_v58, %v1895_v60 }
 0x29e   : > { %v2791_v1 = vadd.f32 %v4922_v50, %v2755_v22 }
 0x29f   : > { %v2392_v63 = vpop.f32.mrf.mxu3 }
 0x2a0   : > { %v2823_v8 = vmax.f32 %v2791_v1, 0.0  ;;  %v2444_v10 = vadd.f32 %v2392_v63, %v2168_v45  ;;  %v2668_v0 = vpop.f32.mrf.mxu0  ;;  %v1854_v19 = vpop.f32.mrf.mxu1  ;;  %v5681_v1 = vld [vmem:[#allocation7_spill] sm:$0xff] }
 0x2a1   : > { %v1620_v63 = vadd.f32 %v5682_v57, %v5681_v1 }
 0x2a2   : > { %v2864_v37 = vadd.f32 %v2863_v59, %v2823_v8  ;;  %v2720_v31 = vadd.f32 %v2668_v0, %v2444_v10 }
 0x2a3   : > { %v2131_v39 = vpop.f32.mrf.mxu2 }
 0x2a4   : > { %v2756_v21 = vmul.f32 %v4908_v51, %v2720_v31  ;;  %v1896_v31 = vadd.f32 %v1854_v19, %v1620_v63 }
 0x2a6   : > { %v2792_v32 = vadd.f32 %v4922_v50, %v2756_v21 }
 0x2a7   : > { %v2395_v15 = vpop.f32.mrf.mxu3 }
 0x2a8   : > { %v2824_v24 = vmax.f32 %v2792_v32, 0.0  ;;  %v2445_v46 = vadd.f32 %v2395_v15, %v2169_v17  ;;  %v2671_v35 = vpop.f32.mrf.mxu0  ;;  %v2960_v17 = vld [vmem:[%s5536_s4 + $0x1f8] sm:$0xff]  ;;  %v2959_v32 = vld [vmem:[%s5536_s4 + $0x1f0] sm:$0xff]  ;;  %v2173_v15 = vadd.f32 %v2131_v39, %v1896_v31 }
 0x2a9   : > { %3022 = vmatpush.msra.mxu1 %v2960_v17  ;;  %v2947_v31 = vld [vmem:[%s5536_s4 + $0x190] sm:$0xff]  ;;  %v2946_v17 = vld [vmem:[%s5536_s4 + $0x188] sm:$0xff] }
 0x2aa   : > { %v2865_v53 = vadd.f32 %v2864_v37, %v2824_v24  ;;  %v2721_v16 = vadd.f32 %v2671_v35, %v2445_v46  ;;  %v1857_v37 = vpop.f32.mrf.mxu1  ;;  %v2958_v24 = vld [vmem:[%s5536_s4 + $0x1e8] sm:$0xff]  ;;  %v5683_v35 = vld [vmem:[#allocation12_spill] sm:$0xff] }
 0x2ab   : > { %v2134_v9 = vpop.f32.mrf.mxu2  ;;  %3023 = vmatpush.msra.mxu1 %v2959_v32 }
 0x2ac   : > { %v2757_v38 = vmul.f32 %v4908_v51, %v2721_v16 }
 0x2ad   : > { %3024 = vmatpush.msra.mxu1 %v2958_v24 }
 0x2ae   : > { %v2793_v5 = vadd.f32 %v4922_v50, %v2757_v38 }
 0x2af   : > { %v2398_v41 = vpop.f32.mrf.mxu3 }
 0x2b0   : > { %v2825_v28 = vmax.f32 %v2793_v5, 0.0  ;;  %v2446_v29 = vadd.f32 %v2398_v41, %v2170_v34  ;;  %v2674_v30 = vpop.f32.mrf.mxu0  ;;  %v2957_v34 = vld [vmem:[%s5536_s4 + $0x1e0] sm:$0xff] }
 0x2b1   : > { %3025 = vmatpush.msra.mxu1 %v2957_v34 }
 0x2b2   : > { %v2866_v6 = vadd.f32 %v2865_v53, %v2825_v28  ;;  %v2722_v43 = vadd.f32 %v2674_v30, %v2446_v29  ;;  %v1621_v53 = vadd.f32 %v5684_v44, %v5683_v35  ;;  %v1860_v26 = vpop.f32.mrf.mxu1  ;;  %v2955_v29 = vld [vmem:[%s5536_s4 + $0x1d0] sm:$0xff] }
 0x2b3   : > { %3026 = vmatpush.msra.mxu1 %v2956_v23 }
 0x2b4   : > { %v2867_v48 = vrot.slane %v2866_v6, 4  ;;  %v2758_v25 = vmul.f32 %v4908_v51, %v2722_v43  ;;  %v1897_v5 = vadd.f32 %v1857_v37, %v1621_v53  ;;  %v5685_v43 = vld [vmem:[#allocation10_spill] sm:$0xff] }
 0x2b5   : > { %3027 = vmatpush.msra.mxu1 %v2955_v29 }
 0x2b6   : > { %v2868_v12 = vadd.f32 %v2867_v48, %v2866_v6  ;;  %v2794_v22 = vadd.f32 %v4922_v50, %v2758_v25  ;;  %v2174_v30 = vadd.f32 %v2134_v9, %v1897_v5  ;;  %v2137_v6 = vpop.f32.mrf.mxu2 }
 0x2b7   : > { %v2401_v54 = vpop.f32.mrf.mxu3  ;;  %3028 = vmatpush.msra.mxu1 %v2954_v13 }
 0x2b8   : > { %v2869_v52 = vrot.slane %v2868_v12, 2  ;;  %v2447_v27 = vadd.f32 %v2401_v54, %v2171_v14  ;;  %v2677_v18 = vpop.f32.mrf.mxu0  ;;  %v2826_v8 = vmax.f32 %v2794_v22, 0.0  ;;  %v5686_v14 = vld [vmem:[#allocation9_spill] sm:$0xff] }
 0x2b9   : > { %3029 = vmatpush.msra.mxu1 %v2953_v20  ;;  %v2950_v22 = vld [vmem:[%s5536_s4 + $0x1a8] sm:$0xff] }
 0x2ba   : > { %v2870_v40 = vadd.f32 %v2869_v52, %v2868_v12  ;;  %v2723_v59 = vadd.f32 %v2677_v18, %v2447_v27  ;;  %v1622_v12 = vadd.f32 %v5686_v14, %v5685_v43  ;;  %v2952_v18 = vld [vmem:[%s5536_s4 + $0x1b8] sm:$0xff] }
 0x2bb   : > { %3030 = vmatpush.msra.mxu1 %v2952_v18  ;;  %v3052_v18 = vld [vmem:[%s5538_s6 + $0x48] sm:$0xff] }
 0x2bc   : > { %v2871_v3 = vrot.slane %v2870_v40, 1  ;;  %v2759_v4 = vmul.f32 %v5365_v62, %v2723_v59  ;;  %v1898_v52 = vadd.f32 %v1860_v26, %v1622_v12  ;;  %v1863_v59 = vpop.f32.mrf.mxu1 }
 0x2be   : > { %v2872_v45 = vadd.f32 %v2871_v3, %v2870_v40  ;;  %v2795_v51 = vadd.f32 %v4922_v50, %v2759_v4  ;;  %v2951_v40 = vld [vmem:[%s5536_s4 + $0x1b0] sm:$0xff]  ;;  %v2175_v39 = vadd.f32 %v2137_v6, %v1898_v52  ;;  %v3058_v52 = vld [vmem:[%s5538_s6 + $0x78] sm:$0xff] }
 0x2bf   : > { %v2404_v36 = vpop.f32.mrf.mxu3  ;;  %3031 = vmatpush.msra.mxu1 %v2951_v40  ;;  %3060 = vmatpush.msra.mxu2 %v3058_v52  ;;  %v3050_v40 = vld [vmem:[%s5538_s6 + $0x38] sm:$0xff] }
 0x2c0   : > { %v2827_v10 = vmax.f32 %v2795_v51, 0.0  ;;  %v2448_v0 = vadd.f32 %v2404_v36, %v2172_v47  ;;  %v2680_v55 = vpop.f32.mrf.mxu0  ;;  %v2895_v42 = vmul.f32 %v5205_v7, %v2872_v45  ;;  %v5687_v47 = vld [vmem:[#allocation18_spill] sm:$0xff]  ;;  %v2949_v36 = vld [vmem:[%s5536_s4 + $0x1a0] sm:$0xff] }
 0x2c1   : > { %3032 = vmatpush.msra.mxu1 %v2950_v22  ;;  %v5688_v45 = vld [vmem:[#allocation14_spill] sm:$0xff]  ;;  %v3046_v22 = vld [vmem:[%s5538_s6 + $0x18] sm:$0xff] }
 0x2c2   : > { %v2873_v11 = vadd.f32 %v2827_v10, %v2826_v8  ;;  %v2724_v21 = vadd.f32 %v2680_v55, %v2448_v0  ;;  %3018 = vmatmul.f32.vlgmr.msrb.gmra.mxu3 %v2895_v42  ;;  %v1623_v51 = vadd.f32 %v5688_v45, %v5687_v47  ;;  %v2140_v8 = vpop.f32.mrf.mxu2  ;;  %v2948_v42 = vld [vmem:[%s5536_s4 + $0x198] sm:$0xff]  ;;  %v3044_v47 = vld [vmem:[%s5538_s6 + $0x8] sm:$0xff]  ;;  %v3043_v45 = vld [vmem:[%s5538_s6] sm:$0xff] }
 0x2c3   : > { %3033 = vmatpush.msra.mxu1 %v2949_v36 }
 0x2c4   : > { %v2760_v50 = vmul.f32 %v5365_v62, %v2724_v21  ;;  %v1899_v10 = vadd.f32 %v1863_v59, %v1623_v51  ;;  %v1866_v32 = vpop.f32.mrf.mxu1  ;;  %v3049_v59 = vld [vmem:[%s5538_s6 + $0x30] sm:$0xff]  ;;  %v2961_v51 = vld [vmem:[%s5537_s5] sm:$0x1] }
 0x2c5   : > { %3034 = vmatpush.msra.mxu1 %v2948_v42 }
 0x2c6   : > { %v2796_v33 = vadd.f32 %v5382_v49, %v2760_v50  ;;  %v2945_v50 = vld [vmem:[%s5536_s4 + $0x180] sm:$0xff] }
 0x2c7   : > { %v2407_v46 = vpop.f32.mrf.mxu3  ;;  %3035 = vmatpush.msra.mxu1 %v2947_v31 }
 0x2c8   : > { %v2828_v16 = vmax.f32 %v2796_v33, 0.0  ;;  %v2449_v38 = vadd.f32 %v2407_v46, %v2173_v15  ;;  %v2683_v61 = vpop.f32.mrf.mxu0  ;;  %v5689_v15 = vld [vmem:[#allocation13_spill] sm:$0xff]  ;;  %v5690_v33 = vld [vmem:[#allocation22_spill] sm:$0xff] }
 0x2c9   : > { %3036 = vmatpush.msra.mxu1 %v2946_v17  ;;  %v1624_v24 = vadd.f32 %v5690_v33, %v5689_v15 }
 0x2ca   : > { %v2874_v41 = vadd.f32 %v2873_v11, %v2828_v16  ;;  %v2725_v2 = vadd.f32 %v2683_v61, %v2449_v38  ;;  %v2176_v11 = vadd.f32 %v2140_v8, %v1899_v10  ;;  %v2143_v61 = vpop.f32.mrf.mxu2 }
 0x2cb   : > { %3037 = vmatpush.msra.mxu1 %v2945_v50  ;;  %v1900_v53 = vadd.f32 %v1866_v32, %v1624_v24 }
 0x2cc   : > { %v2761_v28 = vmul.f32 %v5365_v62, %v2725_v2 }
 0x2cd   : > { %v2177_v5 = vadd.f32 %v2143_v61, %v1900_v53 }
 0x2ce   : > { %v2797_v58 = vadd.f32 %v5382_v49, %v2761_v28 }
 0x2cf   : > { %v2410_v48 = vpop.f32.mrf.mxu3 }
 0x2d0   : > { %v2829_v19 = vmax.f32 %v2797_v58, 0.0  ;;  %v2450_v54 = vadd.f32 %v2410_v48, %v2174_v30  ;;  %v2686_v56 = vpop.f32.mrf.mxu0 }
 0x2d2   : > { %v2875_v25 = vadd.f32 %v2874_v41, %v2829_v19  ;;  %v2726_v27 = vadd.f32 %v2686_v56, %v2450_v54 }
 0x2d4   : > { %v2762_v60 = vmul.f32 %v5365_v62, %v2726_v27  ;;  %v3053_v27 = vld [vmem:[%s5538_s6 + $0x50] sm:$0xff] }
 0x2d6   : > { %v2798_v3 = vadd.f32 %v5382_v49, %v2762_v60  ;;  %v3051_v60 = vld [vmem:[%s5538_s6 + $0x40] sm:$0xff] }
 0x2d7   : > { %v2413_v4 = vpop.f32.mrf.mxu3 }
 0x2d8   : > { %v2830_v1 = vmax.f32 %v2798_v3, 0.0  ;;  %v2451_v57 = vadd.f32 %v2413_v4, %v2175_v39  ;;  %v2689_v63 = vpop.f32.mrf.mxu0  ;;  %v3048_v39 = vld [vmem:[%s5538_s6 + $0x28] sm:$0xff]  ;;  %v3047_v3 = vld [vmem:[%s5538_s6 + $0x20] sm:$0xff]  ;;  %v3045_v4 = vld [vmem:[%s5538_s6 + $0x10] sm:$0xff] }
 0x2da   : > { %v2876_v0 = vadd.f32 %v2875_v25, %v2830_v1  ;;  %v2727_v55 = vadd.f32 %v2689_v63, %v2451_v57  ;;  %v3055_v25 = vld [vmem:[%s5538_s6 + $0x60] sm:$0xff]  ;;  %v2979_v1 = vpop.f32.mrf.mxu1 }
 0x2db   : > { %v2980_v63 = vadd.f32 %v2979_v1, %v2961_v51 }
 0x2dc   : > { %v2763_v37 = vmul.f32 %v5365_v62, %v2727_v55 }
 0x2de   : > { %v2799_v21 = vadd.f32 %v5382_v49, %v2763_v37  ;;  %v3059_v37 = vld [vmem:[%s5539_s7] sm:$0x1] }
 0x2df   : > { %v2416_v9 = vpop.f32.mrf.mxu3 }
 0x2e0   : > { %v2831_v46 = vmax.f32 %v2799_v21, 0.0  ;;  %v2452_v35 = vadd.f32 %v2416_v9, %v2176_v11  ;;  %v2692_v44 = vpop.f32.mrf.mxu0 }
 0x2e2   : > { %v2877_v16 = vadd.f32 %v2876_v0, %v2831_v46  ;;  %v2728_v38 = vadd.f32 %v2692_v44, %v2452_v35 }
 0x2e4   : > { %v2764_v34 = vmul.f32 %v5365_v62, %v2728_v38 }
 0x2e6   : > { %v2800_v41 = vadd.f32 %v5382_v49, %v2764_v34 }
 0x2e7   : > { %v2419_v2 = vpop.f32.mrf.mxu3 }
 0x2e8   : > { %v2832_v23 = vmax.f32 %v2800_v41, 0.0  ;;  %v2453_v26 = vadd.f32 %v2419_v2, %v2177_v5  ;;  %v2695_v28 = vpop.f32.mrf.mxu0 }
 0x2ea   : > { %v2878_v29 = vadd.f32 %v2877_v16, %v2832_v23  ;;  %v2729_v30 = vadd.f32 %v2695_v28, %v2453_v26 }
 0x2ec   : > { %v2765_v58 = vmul.f32 %v5365_v62, %v2729_v30  ;;  %v3057_v62 = vld [vmem:[%s5538_s6 + $0x70] sm:$0xff] }
 0x2ed   : > { %3061 = vmatpush.msra.mxu2 %v3057_v62 }
 0x2ee   : > { %v2801_v13 = vadd.f32 %v5382_v49, %v2765_v58  ;;  %v3056_v49 = vld [vmem:[%s5538_s6 + $0x68] sm:$0xff] }
 0x2ef   : > { %3062 = vmatpush.msra.mxu2 %v3056_v49 }
 0x2f0   : > { %v2833_v6 = vmax.f32 %v2801_v13, 0.0 }
 0x2f1   : > { %3063 = vmatpush.msra.mxu2 %v3055_v25 }
 0x2f2   : > { %v2879_v48 = vadd.f32 %v2878_v29, %v2833_v6 }
 0x2f4   : > { %v2880_v43 = vrot.slane %v2879_v48, 4 }
 0x2f6   : > { %v2881_v14 = vadd.f32 %v2880_v43, %v2879_v48 }
 0x2f8   : > { %v2882_v12 = vrot.slane %v2881_v14, 2 }
 0x2fa   : > { %v2883_v19 = vadd.f32 %v2882_v12, %v2881_v14 }
 0x2fc   : > { %v2884_v54 = vrot.slane %v2883_v19, 1 }
 0x2fe   : > { %v2885_v56 = vadd.f32 %v2884_v54, %v2883_v19 }
 0x300   : > { %v2896_v20 = vmul.f32 %v5205_v7, %v2885_v56  ;;  %v3054_v7 = vld [vmem:[%s5538_s6 + $0x58] sm:$0xff] }
 0x301   : > { %3064 = vmatpush.msra.mxu2 %v3054_v7 }
 0x302   : > { %3038 = vmatmul.f32.vlgmr.msra.gmra.mxu1 %v2896_v20 }
 0x303   : > { %3065 = vmatpush.msra.mxu2 %v3053_v27 }
 0x305   : > { %3066 = vmatpush.msra.mxu2 %v3052_v18  ;;  %v2999_v57 = vpop.f32.mrf.mxu2 }
 0x306   : > { %v3000_v8 = vadd.f32 %v2999_v57, %v2980_v63 }
 0x307   : > { %3067 = vmatpush.msra.mxu2 %v3051_v60 }
 0x309   : > { %3068 = vmatpush.msra.mxu2 %v3050_v40 }
 0x30b   : > { %3069 = vmatpush.msra.mxu2 %v3049_v59 }
 0x30d   : > { %3070 = vmatpush.msra.mxu2 %v3048_v39 }
 0x30f   : > { %3071 = vmatpush.msra.mxu2 %v3047_v3 }
 0x311   : > { %3072 = vmatpush.msra.mxu2 %v3046_v22 }
 0x313   : > { %3073 = vmatpush.msra.mxu2 %v3045_v4 }
 0x315   : > { %3074 = vmatpush.msra.mxu2 %v3044_v47 }
 0x317   : > { %3075 = vmatpush.msra.mxu2 %v3043_v45 }
 0x345   : > { %v3019_v36 = vpop.f32.mrf.mxu3 }
 0x346   : > { %v3020_v10 = vadd.f32 %v3019_v36, %v3000_v8 }
 0x37f   : > { %v3039_v0 = vpop.f32.mrf.mxu1 }
 0x380   : > { %v3040_v55 = vadd.f32 %v3039_v0, %v3020_v10 }
 0x382   : > { %v3042_v42 = vmax.f32 %v3040_v55, 0.0 }
 0x384   : > { %3076 = vmatmul.f32.vlgmr.msra.gmra.mxu2 %v3042_v42 }
 0x407   : > { %v3077_v31 = vpop.f32.mrf.mxu2 }
 0x408   : > { %v3078_v11 = vadd.f32 %v3077_v31, %v3059_v37 }
 0x40a   : > { %3080 = vst [vmem:[%s300_s22] sm:$0x1] %v3078_v11 }
 0x40b   : > { %3733 = shalt.err (!%p3730_p3)
}
 0x40c   : > { %3660 = dma.vmem_to_hbm [thread:$0]  (%p3854_p5), %s3093_s13, 16, %s3095_s23, %s3082_s24  }
 0x40d PF: > { %p3666_p4 = scmp.ge.s32.totalorder %s3768_s30, 2  ;;  %s3106_s12 = sand.u32 1, %s3756_s27  }
 0x40e   : > { %s3107_s19 = scalar_lea.sflag [#allocation3], %s3106_s12 }
 0x40f   : > { %p3663_p7 = pnand %p3666_p4, %p3858_p6 }
 0x411   : > { %p3664_p8 = pneg %p3663_p7 }
 0x413   : > { %3751 = dma.done.wait (%p3664_p8), %s3107_s19, 16  }
 0x414   : > { %3753 = vsyncadd (%p3664_p8), %s3107_s19, 4294967280  ;;  %p18_p9 = scmp.ge.s32.totalorder %s3841_s11, 4   ;;  %s5691_s27 = smov %s3760_s28 }
 0x415   : > { %s5692_s28 = smov %s3764_s29  ;;  %s5693_s29 = smov %s3852_s14 }
 0x416   : > { %s5694_s30 = smov %s3841_s11  ;;  %20 = sbr.rel (!%p18_p9) target bundleno = 3 (0x3), region = 97 }
 0x41b   :  { %3112 = vsyncpa [#allocation3], 1 }
 0x41c   :  { %3114 = vsyncpa [#allocation3 + $0x1], 1 }

</bundles_post_ra>
